<compile_context>
chip_gen: v6e
topology: v6e:2x2x1
jax: 0.10.0
libtpu: 0.0.40
codegen_flags: <defaults>
</compile_context>

<pallas_src>
import functools

import numpy as np
import jax
import jax.numpy as jnp
from jax import lax
from jax.experimental import pallas as pl
from jax.experimental.pallas import tpu as pltpu

NEG_SLOPE = 0.01   # LeakyReLU negative_slope
IN_EPS = 1e-5      # InstanceNorm2d eps
GN_EPS = 1e-5      # GroupNorm eps


# --------------------------------------------------------------------------------------
# Fused kernel: one grid step == one batch sample; everything stays in VMEM.
# --------------------------------------------------------------------------------------
def _fused_forward_kernel(x_ref, w1_ref, w2_ref, p_ref, s_ref, o_ref,
                          pad_ref, patch_ref, *,
                          H, W, Cin, C0, C, K, padl, in_eps, gn_eps, slope):
    HW = H * W
    inv_hw = 1.0 / float(HW)
    R = K // 2
    Ch = C // 2
    mm_dtype = patch_ref.dtype
    Cpad = pad_ref.shape[0]

    # (C, 10) per-channel params: cols 0-3 full length (g1,b1,g2,b2),
    # cols 4-9 use the first Ch rows (cw,cb,sw,sb,gn_w,gn_b expanded per x0/x1 att-channel)
    prm = p_ref[...]

    # horizontal wrap-around masks (one per nonzero dw), hoisted out of both tap loops
    col = lax.broadcasted_iota(jnp.int32, (1, HW), 1) % W
    hmask = {dw: (col >= -dw) if dw < 0 else (col <= (W - 1) - dw)
             for dw in range(-R, R + 1) if dw != 0}

    # zero ONLY the two lane halos; the image region is overwritten by every conv
    pad_ref[:, 0:padl] = jnp.zeros((Cpad, padl), mm_dtype)
    pad_ref[:, padl + HW:] = jnp.zeros((Cpad, pad_ref.shape[1] - padl - HW), mm_dtype)

    def conv_same(w_ref, cin):
        """KxK / stride-1 / 'same' conv as ONE (Cout, K*K*cin) x (K*K*cin, HW) MXU matmul.
        pad_ref[:cin, padl:padl+HW] must already hold the flattened image; vertical
        out-of-range taps read the zero halos, horizontal wrap is masked per column."""
        k = 0
        for kh in range(K):
            for kw in range(K):
                dh, dw = kh - R, kw - R
                start = padl + dh * W + dw               # static python int, >= 0
                v = pad_ref[:cin, start:start + HW]
                if dw != 0:
                    v = jnp.where(hmask[dw], v, jnp.zeros_like(v))
                patch_ref[k * cin:(k + 1) * cin, :] = v
                k += 1
        return jnp.dot(w_ref[...], patch_ref[:K * K * cin, :],
                       preferred_element_type=jnp.float32)

    def inst_norm(y, gamma, beta, eps):
        """Per-channel (per-row) normalization over HW: two-pass stats, biased variance."""
        m = jnp.sum(y, axis=1, keepdims=True) * inv_hw
        d = y - m
        var = jnp.sum(d * d, axis=1, keepdims=True) * inv_hw
        return d * lax.rsqrt(var + eps) * gamma + beta

    def leaky(v):
        return jnp.where(v >= 0.0, v, slope * v)

    # ---- ConvDropoutNormReLU #1: conv -> InstanceNorm(affine) -> LeakyReLU ----
    pad_ref[0:Cin, padl:padl + HW] = x_ref[0].astype(mm_dtype)
    y = conv_same(w1_ref, Cin)
    y = leaky(inst_norm(y, prm[:, 0:1], prm[:, 1:2], in_eps))

    # ---- ShuffleAtt conv: conv -> InstanceNorm(affine), channels in [x0 | x1] order ----
    pad_ref[0:C0, padl:padl + HW] = y.astype(mm_dtype)
    a = conv_same(w2_ref, C0)
    a = inst_norm(a, prm[:, 2:3], prm[:, 3:4], in_eps)

    # ---- ShuffleAttention: channel gate on the x0 half, GN + spatial gate on the x1 half ----
    x0 = a[0:Ch]
    x1 = a[Ch:]

    m0 = jnp.sum(x0, axis=1, keepdims=True) * inv_hw                         # avg-pool, (Ch,1)
    out0 = x0 * jax.nn.sigmoid(prm[0:Ch, 4:5] * m0 + prm[0:Ch, 5:6])

    m1 = jnp.sum(x1, axis=1, keepdims=True) * inv_hw
    d1 = x1 - m1
    v1 = jnp.sum(d1 * d1, axis=1, keepdims=True) * inv_hw
    t = prm[0:Ch, 8:9] * (d1 * lax.rsqrt(v1 + gn_eps)) + prm[0:Ch, 9:10]     # GN, 1 ch/group
    out1 = x1 * jax.nn.sigmoid(prm[0:Ch, 6:7] * t + prm[0:Ch, 7:8])          # (Ch, HW)

    # groups=2 channel shuffle as an exact 0/1 permutation matmul (MXU is idle here)
    out = (jnp.dot(s_ref[:, 0:Ch], out0, preferred_element_type=jnp.float32) +
           jnp.dot(s_ref[:, Ch:], out1, preferred_element_type=jnp.float32))

    # module-level LeakyReLU; store NCHW directly (HW lane-dense, no transpose)
    o_ref[0] = leaky(out)


# --------------------------------------------------------------------------------------
# Wrapper: folds the x0/x1 ordering, channel shuffle and attention params host-side.
# --------------------------------------------------------------------------------------
def shuffle_att_stacked_conv_blocks(x_nchw, p, *, G=8, use_bf16_matmul=False):
    N, Cin, H, W = x_nchw.shape
    C0, wcin, KH, KW = p['w1'].shape
    C = p['w2'].shape[0]
    assert wcin == Cin
    assert KH == KW and KH % 2 == 1, "odd square kernels only"
    assert p['w2'].shape == (C, C0, KH, KW)
    assert C0 == C, "param stacking assumes equal conv widths (true for this module config)"
    K = KH
    HW = H * W
    assert HW % 128 == 0, "H*W must be a multiple of 128 for the lane-dense NCHW layout"
    assert C % (2 * G) == 0
    cpg = C // G
    half = cpg // 2
    Ch = C // 2

    # ---- static channel bookkeeping (host-side, numpy) ----
    # "att order": all x0 channels (local index < half of each G-group) first, then all x1.
    q = np.arange(C)
    second = q >= Ch
    qq = np.where(second, q - Ch, q)
    att_src = (qq // half) * cpg + np.where(second, half + qq % half, qq % half)
    att_pos = np.argsort(att_src)                        # inverse permutation
    j = np.arange(C)
    shuffle_src = (j % 2) * Ch + (j // 2)                # groups=2 channel shuffle source
    S = np.zeros((C, C), np.float32)
    S[j, att_pos[shuffle_src]] = 1.0                     # final[j] = out_att[att_pos[shuffle_src[j]]]

    mm_dtype = jnp.bfloat16 if use_bf16_matmul else jnp.float32

    # weights as (Cout, K*K*Cin), taps major / input-channel minor (matches the patch layout);
    # conv2's output channels pre-ordered into [x0 | x1] att order.
    w1_mat = jnp.transpose(p['w1'], (0, 2, 3, 1)).reshape(C0, K * K * Cin).astype(mm_dtype)
    w2_mat = jnp.transpose(p['w2'], (0, 2, 3, 1)).reshape(C, K * K * C0)
    w2_att = w2_mat[att_src].astype(mm_dtype)

    lidx = np.arange(Ch) % half                          # local param index per att-channel
    zeros_half = jnp.zeros((Ch,), jnp.float32)

    def expand(v):                                       # (half,) -> (C,), upper half zero-padded
        return jnp.concatenate([v.astype(jnp.float32)[lidx], zeros_half])

    pstack = jnp.stack([
        p['g1'].astype(jnp.float32), p['beta1'].astype(jnp.float32),
        p['g2'].astype(jnp.float32)[att_src], p['beta2'].astype(jnp.float32)[att_src],
        expand(p['cweight']), expand(p['cbias']),
        expand(p['sweight']), expand(p['sbias']),
        expand(p['gn_w']), expand(p['gn_b']),
    ], axis=1)                                           # (C, 10), channels on sublanes

    x_flat = x_nchw.reshape(N, Cin, HW).astype(jnp.float32)

    R = K // 2
    P0 = R * W + R                                       # flat halo actually needed
    padl = ((P0 + 127) // 128) * 128                     # lane-aligned halo allocation
    Cmax = max(Cin, C0)

    kern = functools.partial(
        _fused_forward_kernel, H=H, W=W, Cin=Cin, C0=C0, C=C, K=K, padl=padl,
        in_eps=IN_EPS, gn_eps=GN_EPS, slope=NEG_SLOPE)

    out = pl.pallas_call(
        kern,
        out_shape=jax.ShapeDtypeStruct((N, C, HW), jnp.float32),
        grid=(N,),
        in_specs=[
            pl.BlockSpec((1, Cin, HW), lambda n: (n, 0, 0)),      # NCHW slab of one sample
            pl.BlockSpec((C0, K * K * Cin), lambda n: (0, 0)),    # conv1 weights (Cout, taps*Cin)
            pl.BlockSpec((C, K * K * C0), lambda n: (0, 0)),      # conv2 weights, [x0|x1] ordered
            pl.BlockSpec((C, 10), lambda n: (0, 0)),              # stacked per-channel params
            pl.BlockSpec((C, C), lambda n: (0, 0)),               # shuffle permutation matrix
        ],
        out_specs=pl.BlockSpec((1, C, HW), lambda n: (n, 0, 0)),  # NCHW output, HW on lanes
        scratch_shapes=[
            pltpu.VMEM((Cmax, HW + 2 * padl), mm_dtype),          # lane-padded image (halo zeros)
            pltpu.VMEM((K * K * Cmax, HW), mm_dtype),             # patch block for the fused matmul
        ],
        compiler_params=pltpu.CompilerParams(
            dimension_semantics=("parallel",),                    # N>=2 keeps both v7x TCs busy
            vmem_limit_bytes=32 * 1024 * 1024,
        ),
    )(x_flat, w1_mat, w2_att, pstack, jnp.asarray(S))

    return out.reshape(N, C, H, W)


# --------------------------------------------------------------------------------------
# Pure-JAX reference (mirrors the PyTorch forward) for verification.
# --------------------------------------------------------------------------------------
def reference_forward(x_nchw, p, *, G=8):
    def conv_in(x, w, g, beta, act):
        y = lax.conv_general_dilated(x, w, (1, 1), [(1, 1), (1, 1)],
                                     dimension_numbers=('NCHW', 'OIHW', 'NCHW'))
        m = y.mean(axis=(2, 3), keepdims=True)
        v = y.var(axis=(2, 3), keepdims=True)
        y = (y - m) / jnp.sqrt(v + IN_EPS) * g[None, :, None, None] + beta[None, :, None, None]
        if act:
            y = jnp.where(y >= 0, y, NEG_SLOPE * y)
        return y

    x = conv_in(x_nchw, p['w1'], p['g1'], p['beta1'], True)
    x = conv_in(x, p['w2'], p['g2'], p['beta2'], False)

    b, c, h, w = x.shape
    half = c // (2 * G)
    xg = x.reshape(b * G, c // G, h, w)
    x0, x1 = xg[:, :half], xg[:, half:]
    xc = x0.mean(axis=(2, 3), keepdims=True)
    xc = p['cweight'][None, :, None, None] * xc + p['cbias'][None, :, None, None]
    xc = x0 * jax.nn.sigmoid(xc)
    m = x1.mean(axis=(2, 3), keepdims=True)
    v = x1.var(axis=(2, 3), keepdims=True)
    xs = (x1 - m) / jnp.sqrt(v + GN_EPS)
    xs = xs * p['gn_w'][None, :, None, None] + p['gn_b'][None, :, None, None]
    xs = p['sweight'][None, :, None, None] * xs + p['sbias'][None, :, None, None]
    xs = x1 * jax.nn.sigmoid(xs)
    out = jnp.concatenate([xc, xs], axis=1).reshape(b, c, h, w)
    out = out.reshape(b, 2, c // 2, h, w).transpose(0, 2, 1, 3, 4).reshape(b, c, h, w)
    out = jnp.where(out >= 0, out, NEG_SLOPE * out)
    return out


if __name__ == "__main__":
    key = jax.random.PRNGKey(0)
    ks = jax.random.split(key, 16)

    N, Cin, H, W = 2, 4, 16, 16
    C0 = C1 = 32          # output_channels = [32, 32]; channel=32 divisible by 2*G=16
    G = 8
    half = C1 // (2 * G)  # = 2

    params = dict(
        w1=0.2 * jax.random.normal(ks[0], (C0, Cin, 3, 3), jnp.float32),
        g1=1.0 + 0.1 * jax.random.normal(ks[2], (C0,), jnp.float32),
        beta1=0.1 * jax.random.normal(ks[3], (C0,), jnp.float32),
        w2=0.1 * jax.random.normal(ks[4], (C1, C0, 3, 3), jnp.float32),
        g2=1.0 + 0.1 * jax.random.normal(ks[6], (C1,), jnp.float32),
        beta2=0.1 * jax.random.normal(ks[7], (C1,), jnp.float32),
        cweight=0.5 * jax.random.normal(ks[8], (half,), jnp.float32),
        cbias=1.0 + 0.1 * jax.random.normal(ks[9], (half,), jnp.float32),
        sweight=0.5 * jax.random.normal(ks[10], (half,), jnp.float32),
        sbias=1.0 + 0.1 * jax.random.normal(ks[11], (half,), jnp.float32),
        gn_w=1.0 + 0.1 * jax.random.normal(ks[12], (half,), jnp.float32),
        gn_b=0.1 * jax.random.normal(ks[13], (half,), jnp.float32),
    )
    x = jax.random.normal(ks[14], (N, Cin, H, W), jnp.float32)

    out = jax.jit(shuffle_att_stacked_conv_blocks)(x, params)
    out = jax.block_until_ready(out)

    ref = reference_forward(x, params, G=G)
    err = float(jnp.max(jnp.abs(out - ref)))
    assert out.shape == (N, C1, H, W), out.shape
    assert err < 1e-3, f"max abs err {err}"
    print("KERNEL_OK")
</pallas_src>

<mosaic_0001>
module attributes {stable_mosaic.version = 11 : i64} {
  func.func @_fused_forward_kernel(%arg0: i32, %arg1: memref<1x4x256xf32, #tpu.memory_space<vmem>>, %arg2: memref<32x36xf32, #tpu.memory_space<vmem>>, %arg3: memref<32x288xf32, #tpu.memory_space<vmem>>, %arg4: memref<32x10xf32, #tpu.memory_space<vmem>>, %arg5: memref<32x32xf32, #tpu.memory_space<vmem>>, %arg6: memref<1x32x256xf32, #tpu.memory_space<vmem>>, %arg7: memref<32x512xf32, #tpu.memory_space<vmem>>, %arg8: memref<288x256xf32, #tpu.memory_space<vmem>>) attributes {dimension_semantics = [#tpu.dimension_semantics<parallel>], iteration_bounds = array<i64: 2>, scalar_prefetch = 0 : i64, scratch_operands = 2 : i64, tpu.core_type = #tpu.core_type<tc>, window_params = [{transform_indices = @transform_0, window_bounds = array<i64: 1, 4, 256>}, {pipeline_mode = #tpu.pipeline_mode<synchronous>, transform_indices = @transform_1, window_bounds = array<i64: 32, 36>}, {pipeline_mode = #tpu.pipeline_mode<synchronous>, transform_indices = @transform_2, window_bounds = array<i64: 32, 288>}, {pipeline_mode = #tpu.pipeline_mode<synchronous>, transform_indices = @transform_3, window_bounds = array<i64: 32, 10>}, {pipeline_mode = #tpu.pipeline_mode<synchronous>, transform_indices = @transform_4, window_bounds = array<i64: 32, 32>}, {transform_indices = @transform_5, window_bounds = array<i64: 1, 32, 256>}]} {
    %c0 = arith.constant 0 : index
    %c0_0 = arith.constant 0 : index
    %0 = vector.load %arg4[%c0, %c0_0] : memref<32x10xf32, #tpu.memory_space<vmem>>, vector<32x10xf32>
    %1 = tpu.iota {dimensions = array<i32: 1>} : vector<1x256xi32>
    %c16_i32 = arith.constant 16 : i32
    %c0_i32 = arith.constant 0 : i32
    %2 = arith.cmpi eq, %c16_i32, %c0_i32 : i32
    %c1_i32 = arith.constant 1 : i32
    %3 = arith.select %2, %c1_i32, %c16_i32 : i32
    %4 = vector.broadcast %3 : i32 to vector<1x256xi32>
    %5 = arith.remsi %1, %4 : vector<1x256xi32>
    %c0_i32_1 = arith.constant 0 : i32
    %6 = vector.broadcast %c0_i32_1 : i32 to vector<1x256xi32>
    %7 = arith.cmpi ne, %5, %6 : vector<1x256xi32>
    %c0_i32_2 = arith.constant 0 : i32
    %8 = vector.broadcast %c0_i32_2 : i32 to vector<1x256xi32>
    %9 = arith.cmpi slt, %5, %8 : vector<1x256xi32>
    %c0_i32_3 = arith.constant 0 : i32
    %10 = arith.cmpi slt, %3, %c0_i32_3 : i32
    %11 = vector.broadcast %10 : i1 to vector<1x256xi1>
    %12 = vector.broadcast %11 : vector<1x256xi1> to vector<1x256xi1>
    %13 = arith.xori %9, %12 : vector<1x256xi1>
    %14 = arith.andi %13, %7 : vector<1x256xi1>
    %15 = vector.broadcast %3 : i32 to vector<1x256xi32>
    %16 = arith.addi %5, %15 : vector<1x256xi32>
    %17 = arith.select %14, %16, %5 : vector<1x256xi1>, vector<1x256xi32>
    %c1_i32_4 = arith.constant 1 : i32
    %18 = vector.broadcast %c1_i32_4 : i32 to vector<1x256xi32>
    %19 = arith.cmpi sge, %17, %18 : vector<1x256xi32>
    %c14_i32 = arith.constant 14 : i32
    %20 = vector.broadcast %c14_i32 : i32 to vector<1x256xi32>
    %21 = arith.cmpi sle, %17, %20 : vector<1x256xi32>
    %cst = arith.constant 0.000000e+00 : f32
    %22 = vector.broadcast %cst : f32 to vector<32x128xf32>
    %c0_5 = arith.constant 0 : index
    %c0_6 = arith.constant 0 : index
    %23 = vector.load %arg7[%c0_5, %c0_6] : memref<32x512xf32, #tpu.memory_space<vmem>>, vector<32x128xf32>
    tpu.vector_store %arg7[%c0_5, %c0_6], %22 {strides = array<i32>} : memref<32x512xf32, #tpu.memory_space<vmem>>, vector<32x128xf32>,
    %cst_7 = arith.constant 0.000000e+00 : f32
    %24 = vector.broadcast %cst_7 : f32 to vector<32x128xf32>
    %c0_8 = arith.constant 0 : index
    %c384 = arith.constant 384 : index
    %25 = vector.load %arg7[%c0_8, %c384] : memref<32x512xf32, #tpu.memory_space<vmem>>, vector<32x128xf32>
    tpu.vector_store %arg7[%c0_8, %c384], %24 {strides = array<i32>} : memref<32x512xf32, #tpu.memory_space<vmem>>, vector<32x128xf32>,
    %c0_9 = arith.constant 0 : index
    %c0_10 = arith.constant 0 : index
    %c0_11 = arith.constant 0 : index
    %26 = vector.load %arg1[%c0_9, %c0_10, %c0_11] : memref<1x4x256xf32, #tpu.memory_space<vmem>>, vector<1x4x256xf32>
    %27 = vector.shape_cast %26 : vector<1x4x256xf32> to vector<4x256xf32>
    %c0_12 = arith.constant 0 : index
    %c128 = arith.constant 128 : index
    %28 = vector.load %arg7[%c0_12, %c128] : memref<32x512xf32, #tpu.memory_space<vmem>>, vector<4x256xf32>
    tpu.vector_store %arg7[%c0_12, %c128], %27 {strides = array<i32>} : memref<32x512xf32, #tpu.memory_space<vmem>>, vector<4x256xf32>,
    %c0_13 = arith.constant 0 : index
    %c111 = arith.constant 111 : index
    %29 = vector.load %arg7[%c0_13, %c111] : memref<32x512xf32, #tpu.memory_space<vmem>>, vector<4x256xf32>
    %cst_14 = arith.constant 0.000000e+00 : f32
    %30 = vector.broadcast %cst_14 : f32 to vector<4x256xf32>
    %31 = vector.shape_cast %19 : vector<1x256xi1> to vector<1x256xi1>
    %32 = vector.broadcast %31 : vector<1x256xi1> to vector<4x256xi1>
    %33 = arith.select %32, %29, %30 : vector<4x256xi1>, vector<4x256xf32>
    %c0_15 = arith.constant 0 : index
    %c0_16 = arith.constant 0 : index
    %34 = vector.load %arg8[%c0_15, %c0_16] : memref<288x256xf32, #tpu.memory_space<vmem>>, vector<4x256xf32>
    tpu.vector_store %arg8[%c0_15, %c0_16], %33 {strides = array<i32>} : memref<288x256xf32, #tpu.memory_space<vmem>>, vector<4x256xf32>,
    %c0_17 = arith.constant 0 : index
    %c112 = arith.constant 112 : index
    %35 = vector.load %arg7[%c0_17, %c112] : memref<32x512xf32, #tpu.memory_space<vmem>>, vector<4x256xf32>
    %c4 = arith.constant 4 : index
    %c0_18 = arith.constant 0 : index
    %36 = vector.load %arg8[%c4, %c0_18] : memref<288x256xf32, #tpu.memory_space<vmem>>, vector<4x256xf32>
    tpu.vector_store %arg8[%c4, %c0_18], %35 {strides = array<i32>} : memref<288x256xf32, #tpu.memory_space<vmem>>, vector<4x256xf32>,
    %c0_19 = arith.constant 0 : index
    %c113 = arith.constant 113 : index
    %37 = vector.load %arg7[%c0_19, %c113] : memref<32x512xf32, #tpu.memory_space<vmem>>, vector<4x256xf32>
    %cst_20 = arith.constant 0.000000e+00 : f32
    %38 = vector.broadcast %cst_20 : f32 to vector<4x256xf32>
    %39 = vector.shape_cast %21 : vector<1x256xi1> to vector<1x256xi1>
    %40 = vector.broadcast %39 : vector<1x256xi1> to vector<4x256xi1>
    %41 = arith.select %40, %37, %38 : vector<4x256xi1>, vector<4x256xf32>
    %c8 = arith.constant 8 : index
    %c0_21 = arith.constant 0 : index
    %42 = vector.load %arg8[%c8, %c0_21] : memref<288x256xf32, #tpu.memory_space<vmem>>, vector<4x256xf32>
    tpu.vector_store %arg8[%c8, %c0_21], %41 {strides = array<i32>} : memref<288x256xf32, #tpu.memory_space<vmem>>, vector<4x256xf32>,
    %c0_22 = arith.constant 0 : index
    %c127 = arith.constant 127 : index
    %43 = vector.load %arg7[%c0_22, %c127] : memref<32x512xf32, #tpu.memory_space<vmem>>, vector<4x256xf32>
    %cst_23 = arith.constant 0.000000e+00 : f32
    %44 = vector.broadcast %cst_23 : f32 to vector<4x256xf32>
    %45 = vector.shape_cast %19 : vector<1x256xi1> to vector<1x256xi1>
    %46 = vector.broadcast %45 : vector<1x256xi1> to vector<4x256xi1>
    %47 = arith.select %46, %43, %44 : vector<4x256xi1>, vector<4x256xf32>
    %c12 = arith.constant 12 : index
    %c0_24 = arith.constant 0 : index
    %48 = vector.load %arg8[%c12, %c0_24] : memref<288x256xf32, #tpu.memory_space<vmem>>, vector<4x256xf32>
    tpu.vector_store %arg8[%c12, %c0_24], %47 {strides = array<i32>} : memref<288x256xf32, #tpu.memory_space<vmem>>, vector<4x256xf32>,
    %c0_25 = arith.constant 0 : index
    %c128_26 = arith.constant 128 : index
    %49 = vector.load %arg7[%c0_25, %c128_26] : memref<32x512xf32, #tpu.memory_space<vmem>>, vector<4x256xf32>
    %c16 = arith.constant 16 : index
    %c0_27 = arith.constant 0 : index
    %50 = vector.load %arg8[%c16, %c0_27] : memref<288x256xf32, #tpu.memory_space<vmem>>, vector<4x256xf32>
    tpu.vector_store %arg8[%c16, %c0_27], %49 {strides = array<i32>} : memref<288x256xf32, #tpu.memory_space<vmem>>, vector<4x256xf32>,
    %c0_28 = arith.constant 0 : index
    %c129 = arith.constant 129 : index
    %51 = vector.load %arg7[%c0_28, %c129] : memref<32x512xf32, #tpu.memory_space<vmem>>, vector<4x256xf32>
    %cst_29 = arith.constant 0.000000e+00 : f32
    %52 = vector.broadcast %cst_29 : f32 to vector<4x256xf32>
    %53 = vector.shape_cast %21 : vector<1x256xi1> to vector<1x256xi1>
    %54 = vector.broadcast %53 : vector<1x256xi1> to vector<4x256xi1>
    %55 = arith.select %54, %51, %52 : vector<4x256xi1>, vector<4x256xf32>
    %c20 = arith.constant 20 : index
    %c0_30 = arith.constant 0 : index
    %56 = vector.load %arg8[%c20, %c0_30] : memref<288x256xf32, #tpu.memory_space<vmem>>, vector<4x256xf32>
    tpu.vector_store %arg8[%c20, %c0_30], %55 {strides = array<i32>} : memref<288x256xf32, #tpu.memory_space<vmem>>, vector<4x256xf32>,
    %c0_31 = arith.constant 0 : index
    %c143 = arith.constant 143 : index
    %57 = vector.load %arg7[%c0_31, %c143] : memref<32x512xf32, #tpu.memory_space<vmem>>, vector<4x256xf32>
    %cst_32 = arith.constant 0.000000e+00 : f32
    %58 = vector.broadcast %cst_32 : f32 to vector<4x256xf32>
    %59 = vector.shape_cast %19 : vector<1x256xi1> to vector<1x256xi1>
    %60 = vector.broadcast %59 : vector<1x256xi1> to vector<4x256xi1>
    %61 = arith.select %60, %57, %58 : vector<4x256xi1>, vector<4x256xf32>
    %c24 = arith.constant 24 : index
    %c0_33 = arith.constant 0 : index
    %62 = vector.load %arg8[%c24, %c0_33] : memref<288x256xf32, #tpu.memory_space<vmem>>, vector<4x256xf32>
    tpu.vector_store %arg8[%c24, %c0_33], %61 {strides = array<i32>} : memref<288x256xf32, #tpu.memory_space<vmem>>, vector<4x256xf32>,
    %c0_34 = arith.constant 0 : index
    %c144 = arith.constant 144 : index
    %63 = vector.load %arg7[%c0_34, %c144] : memref<32x512xf32, #tpu.memory_space<vmem>>, vector<4x256xf32>
    %c28 = arith.constant 28 : index
    %c0_35 = arith.constant 0 : index
    %64 = vector.load %arg8[%c28, %c0_35] : memref<288x256xf32, #tpu.memory_space<vmem>>, vector<4x256xf32>
    tpu.vector_store %arg8[%c28, %c0_35], %63 {strides = array<i32>} : memref<288x256xf32, #tpu.memory_space<vmem>>, vector<4x256xf32>,
    %c0_36 = arith.constant 0 : index
    %c145 = arith.constant 145 : index
    %65 = vector.load %arg7[%c0_36, %c145] : memref<32x512xf32, #tpu.memory_space<vmem>>, vector<4x256xf32>
    %cst_37 = arith.constant 0.000000e+00 : f32
    %66 = vector.broadcast %cst_37 : f32 to vector<4x256xf32>
    %67 = vector.shape_cast %21 : vector<1x256xi1> to vector<1x256xi1>
    %68 = vector.broadcast %67 : vector<1x256xi1> to vector<4x256xi1>
    %69 = arith.select %68, %65, %66 : vector<4x256xi1>, vector<4x256xf32>
    %c32 = arith.constant 32 : index
    %c0_38 = arith.constant 0 : index
    %70 = vector.load %arg8[%c32, %c0_38] : memref<288x256xf32, #tpu.memory_space<vmem>>, vector<4x256xf32>
    tpu.vector_store %arg8[%c32, %c0_38], %69 {strides = array<i32>} : memref<288x256xf32, #tpu.memory_space<vmem>>, vector<4x256xf32>,
    %c0_39 = arith.constant 0 : index
    %c0_40 = arith.constant 0 : index
    %71 = vector.load %arg2[%c0_39, %c0_40] : memref<32x36xf32, #tpu.memory_space<vmem>>, vector<32x36xf32>
    %c0_41 = arith.constant 0 : index
    %c0_42 = arith.constant 0 : index
    %72 = vector.load %arg8[%c0_41, %c0_42] : memref<288x256xf32, #tpu.memory_space<vmem>>, vector<36x256xf32>
    %cst_43 = arith.constant dense<0.000000e+00> : vector<32x256xf32>
    %73 = tpu.matmul %71, %72, %cst_43 {dimension_numbers = #tpu.dot_dimension_numbers<[1], [0], [0], [1], [0, 0, 1, 1], [], []>} : vector<32x36xf32>, vector<36x256xf32>, vector<32x256xf32> -> vector<32x256xf32>
    %74 = vector.extract_strided_slice %0 {offsets = [0, 0], sizes = [32, 1], strides = [1, 1]} : vector<32x10xf32> to vector<32x1xf32>
    %75 = vector.extract_strided_slice %0 {offsets = [0, 1], sizes = [32, 1], strides = [1, 1]} : vector<32x10xf32> to vector<32x1xf32>
    %cst_44 = arith.constant dense<0.000000e+00> : vector<32xf32>
    %76 = vector.multi_reduction <add>, %73, %cst_44 [1] : vector<32x256xf32> to vector<32xf32>
    %77 = vector.shape_cast %76 : vector<32xf32> to vector<32x1xf32>
    %cst_45 = arith.constant 3.906250e-03 : f32
    %78 = vector.broadcast %cst_45 : f32 to vector<32x1xf32>
    %79 = arith.mulf %77, %78 : vector<32x1xf32>
    %80 = vector.broadcast %79 : vector<32x1xf32> to vector<32x256xf32>
    %81 = arith.subf %73, %80 : vector<32x256xf32>
    %82 = arith.mulf %81, %81 : vector<32x256xf32>
    %cst_46 = arith.constant dense<0.000000e+00> : vector<32xf32>
    %83 = vector.multi_reduction <add>, %82, %cst_46 [1] : vector<32x256xf32> to vector<32xf32>
    %84 = vector.shape_cast %83 : vector<32xf32> to vector<32x1xf32>
    %cst_47 = arith.constant 3.906250e-03 : f32
    %85 = vector.broadcast %cst_47 : f32 to vector<32x1xf32>
    %86 = arith.mulf %84, %85 : vector<32x1xf32>
    %cst_48 = arith.constant 9.99999974E-6 : f32
    %87 = vector.broadcast %cst_48 : f32 to vector<32x1xf32>
    %88 = arith.addf %86, %87 : vector<32x1xf32>
    %89 = math.rsqrt %88 : vector<32x1xf32>
    %90 = vector.broadcast %89 : vector<32x1xf32> to vector<32x256xf32>
    %91 = arith.mulf %81, %90 : vector<32x256xf32>
    %92 = vector.broadcast %74 : vector<32x1xf32> to vector<32x256xf32>
    %93 = arith.mulf %91, %92 : vector<32x256xf32>
    %94 = vector.broadcast %75 : vector<32x1xf32> to vector<32x256xf32>
    %95 = arith.addf %93, %94 : vector<32x256xf32>
    %cst_49 = arith.constant 0.000000e+00 : f32
    %96 = vector.broadcast %cst_49 : f32 to vector<32x256xf32>
    %97 = arith.cmpf oge, %95, %96 : vector<32x256xf32>
    %cst_50 = arith.constant 0.00999999977 : f32
    %98 = vector.broadcast %cst_50 : f32 to vector<32x256xf32>
    %99 = arith.mulf %98, %95 : vector<32x256xf32>
    %100 = arith.select %97, %95, %99 : vector<32x256xi1>, vector<32x256xf32>
    %c0_51 = arith.constant 0 : index
    %c128_52 = arith.constant 128 : index
    %101 = vector.load %arg7[%c0_51, %c128_52] : memref<32x512xf32, #tpu.memory_space<vmem>>, vector<32x256xf32>
    tpu.vector_store %arg7[%c0_51, %c128_52], %100 {strides = array<i32>} : memref<32x512xf32, #tpu.memory_space<vmem>>, vector<32x256xf32>,
    %c0_53 = arith.constant 0 : index
    %c111_54 = arith.constant 111 : index
    %102 = vector.load %arg7[%c0_53, %c111_54] : memref<32x512xf32, #tpu.memory_space<vmem>>, vector<32x256xf32>
    %cst_55 = arith.constant 0.000000e+00 : f32
    %103 = vector.broadcast %cst_55 : f32 to vector<32x256xf32>
    %104 = vector.shape_cast %19 : vector<1x256xi1> to vector<1x256xi1>
    %105 = vector.broadcast %104 : vector<1x256xi1> to vector<32x256xi1>
    %106 = arith.select %105, %102, %103 : vector<32x256xi1>, vector<32x256xf32>
    %c0_56 = arith.constant 0 : index
    %c0_57 = arith.constant 0 : index
    %107 = vector.load %arg8[%c0_56, %c0_57] : memref<288x256xf32, #tpu.memory_space<vmem>>, vector<32x256xf32>
    tpu.vector_store %arg8[%c0_56, %c0_57], %106 {strides = array<i32>} : memref<288x256xf32, #tpu.memory_space<vmem>>, vector<32x256xf32>,
    %c0_58 = arith.constant 0 : index
    %c112_59 = arith.constant 112 : index
    %108 = vector.load %arg7[%c0_58, %c112_59] : memref<32x512xf32, #tpu.memory_space<vmem>>, vector<32x256xf32>
    %c32_60 = arith.constant 32 : index
    %c0_61 = arith.constant 0 : index
    %109 = vector.load %arg8[%c32_60, %c0_61] : memref<288x256xf32, #tpu.memory_space<vmem>>, vector<32x256xf32>
    tpu.vector_store %arg8[%c32_60, %c0_61], %108 {strides = array<i32>} : memref<288x256xf32, #tpu.memory_space<vmem>>, vector<32x256xf32>,
    %c0_62 = arith.constant 0 : index
    %c113_63 = arith.constant 113 : index
    %110 = vector.load %arg7[%c0_62, %c113_63] : memref<32x512xf32, #tpu.memory_space<vmem>>, vector<32x256xf32>
    %cst_64 = arith.constant 0.000000e+00 : f32
    %111 = vector.broadcast %cst_64 : f32 to vector<32x256xf32>
    %112 = vector.shape_cast %21 : vector<1x256xi1> to vector<1x256xi1>
    %113 = vector.broadcast %112 : vector<1x256xi1> to vector<32x256xi1>
    %114 = arith.select %113, %110, %111 : vector<32x256xi1>, vector<32x256xf32>
    %c64 = arith.constant 64 : index
    %c0_65 = arith.constant 0 : index
    %115 = vector.load %arg8[%c64, %c0_65] : memref<288x256xf32, #tpu.memory_space<vmem>>, vector<32x256xf32>
    tpu.vector_store %arg8[%c64, %c0_65], %114 {strides = array<i32>} : memref<288x256xf32, #tpu.memory_space<vmem>>, vector<32x256xf32>,
    %c0_66 = arith.constant 0 : index
    %c127_67 = arith.constant 127 : index
    %116 = vector.load %arg7[%c0_66, %c127_67] : memref<32x512xf32, #tpu.memory_space<vmem>>, vector<32x256xf32>
    %cst_68 = arith.constant 0.000000e+00 : f32
    %117 = vector.broadcast %cst_68 : f32 to vector<32x256xf32>
    %118 = vector.shape_cast %19 : vector<1x256xi1> to vector<1x256xi1>
    %119 = vector.broadcast %118 : vector<1x256xi1> to vector<32x256xi1>
    %120 = arith.select %119, %116, %117 : vector<32x256xi1>, vector<32x256xf32>
    %c96 = arith.constant 96 : index
    %c0_69 = arith.constant 0 : index
    %121 = vector.load %arg8[%c96, %c0_69] : memref<288x256xf32, #tpu.memory_space<vmem>>, vector<32x256xf32>
    tpu.vector_store %arg8[%c96, %c0_69], %120 {strides = array<i32>} : memref<288x256xf32, #tpu.memory_space<vmem>>, vector<32x256xf32>,
    %c0_70 = arith.constant 0 : index
    %c128_71 = arith.constant 128 : index
    %122 = vector.load %arg7[%c0_70, %c128_71] : memref<32x512xf32, #tpu.memory_space<vmem>>, vector<32x256xf32>
    %c128_72 = arith.constant 128 : index
    %c0_73 = arith.constant 0 : index
    %123 = vector.load %arg8[%c128_72, %c0_73] : memref<288x256xf32, #tpu.memory_space<vmem>>, vector<32x256xf32>
    tpu.vector_store %arg8[%c128_72, %c0_73], %122 {strides = array<i32>} : memref<288x256xf32, #tpu.memory_space<vmem>>, vector<32x256xf32>,
    %c0_74 = arith.constant 0 : index
    %c129_75 = arith.constant 129 : index
    %124 = vector.load %arg7[%c0_74, %c129_75] : memref<32x512xf32, #tpu.memory_space<vmem>>, vector<32x256xf32>
    %cst_76 = arith.constant 0.000000e+00 : f32
    %125 = vector.broadcast %cst_76 : f32 to vector<32x256xf32>
    %126 = vector.shape_cast %21 : vector<1x256xi1> to vector<1x256xi1>
    %127 = vector.broadcast %126 : vector<1x256xi1> to vector<32x256xi1>
    %128 = arith.select %127, %124, %125 : vector<32x256xi1>, vector<32x256xf32>
    %c160 = arith.constant 160 : index
    %c0_77 = arith.constant 0 : index
    %129 = vector.load %arg8[%c160, %c0_77] : memref<288x256xf32, #tpu.memory_space<vmem>>, vector<32x256xf32>
    tpu.vector_store %arg8[%c160, %c0_77], %128 {strides = array<i32>} : memref<288x256xf32, #tpu.memory_space<vmem>>, vector<32x256xf32>,
    %c0_78 = arith.constant 0 : index
    %c143_79 = arith.constant 143 : index
    %130 = vector.load %arg7[%c0_78, %c143_79] : memref<32x512xf32, #tpu.memory_space<vmem>>, vector<32x256xf32>
    %cst_80 = arith.constant 0.000000e+00 : f32
    %131 = vector.broadcast %cst_80 : f32 to vector<32x256xf32>
    %132 = vector.shape_cast %19 : vector<1x256xi1> to vector<1x256xi1>
    %133 = vector.broadcast %132 : vector<1x256xi1> to vector<32x256xi1>
    %134 = arith.select %133, %130, %131 : vector<32x256xi1>, vector<32x256xf32>
    %c192 = arith.constant 192 : index
    %c0_81 = arith.constant 0 : index
    %135 = vector.load %arg8[%c192, %c0_81] : memref<288x256xf32, #tpu.memory_space<vmem>>, vector<32x256xf32>
    tpu.vector_store %arg8[%c192, %c0_81], %134 {strides = array<i32>} : memref<288x256xf32, #tpu.memory_space<vmem>>, vector<32x256xf32>,
    %c0_82 = arith.constant 0 : index
    %c144_83 = arith.constant 144 : index
    %136 = vector.load %arg7[%c0_82, %c144_83] : memref<32x512xf32, #tpu.memory_space<vmem>>, vector<32x256xf32>
    %c224 = arith.constant 224 : index
    %c0_84 = arith.constant 0 : index
    %137 = vector.load %arg8[%c224, %c0_84] : memref<288x256xf32, #tpu.memory_space<vmem>>, vector<32x256xf32>
    tpu.vector_store %arg8[%c224, %c0_84], %136 {strides = array<i32>} : memref<288x256xf32, #tpu.memory_space<vmem>>, vector<32x256xf32>,
    %c0_85 = arith.constant 0 : index
    %c145_86 = arith.constant 145 : index
    %138 = vector.load %arg7[%c0_85, %c145_86] : memref<32x512xf32, #tpu.memory_space<vmem>>, vector<32x256xf32>
    %cst_87 = arith.constant 0.000000e+00 : f32
    %139 = vector.broadcast %cst_87 : f32 to vector<32x256xf32>
    %140 = vector.shape_cast %21 : vector<1x256xi1> to vector<1x256xi1>
    %141 = vector.broadcast %140 : vector<1x256xi1> to vector<32x256xi1>
    %142 = arith.select %141, %138, %139 : vector<32x256xi1>, vector<32x256xf32>
    %c256 = arith.constant 256 : index
    %c0_88 = arith.constant 0 : index
    %143 = vector.load %arg8[%c256, %c0_88] : memref<288x256xf32, #tpu.memory_space<vmem>>, vector<32x256xf32>
    tpu.vector_store %arg8[%c256, %c0_88], %142 {strides = array<i32>} : memref<288x256xf32, #tpu.memory_space<vmem>>, vector<32x256xf32>,
    %c0_89 = arith.constant 0 : index
    %c0_90 = arith.constant 0 : index
    %144 = vector.load %arg3[%c0_89, %c0_90] : memref<32x288xf32, #tpu.memory_space<vmem>>, vector<32x288xf32>
    %c0_91 = arith.constant 0 : index
    %c0_92 = arith.constant 0 : index
    %145 = vector.load %arg8[%c0_91, %c0_92] : memref<288x256xf32, #tpu.memory_space<vmem>>, vector<288x256xf32>
    %cst_93 = arith.constant dense<0.000000e+00> : vector<32x256xf32>
    %146 = tpu.matmul %144, %145, %cst_93 {dimension_numbers = #tpu.dot_dimension_numbers<[1], [0], [0], [1], [0, 0, 1, 1], [], []>} : vector<32x288xf32>, vector<288x256xf32>, vector<32x256xf32> -> vector<32x256xf32>
    %147 = vector.extract_strided_slice %0 {offsets = [0, 2], sizes = [32, 1], strides = [1, 1]} : vector<32x10xf32> to vector<32x1xf32>
    %148 = vector.extract_strided_slice %0 {offsets = [0, 3], sizes = [32, 1], strides = [1, 1]} : vector<32x10xf32> to vector<32x1xf32>
    %cst_94 = arith.constant dense<0.000000e+00> : vector<32xf32>
    %149 = vector.multi_reduction <add>, %146, %cst_94 [1] : vector<32x256xf32> to vector<32xf32>
    %150 = vector.shape_cast %149 : vector<32xf32> to vector<32x1xf32>
    %cst_95 = arith.constant 3.906250e-03 : f32
    %151 = vector.broadcast %cst_95 : f32 to vector<32x1xf32>
    %152 = arith.mulf %150, %151 : vector<32x1xf32>
    %153 = vector.broadcast %152 : vector<32x1xf32> to vector<32x256xf32>
    %154 = arith.subf %146, %153 : vector<32x256xf32>
    %155 = arith.mulf %154, %154 : vector<32x256xf32>
    %cst_96 = arith.constant dense<0.000000e+00> : vector<32xf32>
    %156 = vector.multi_reduction <add>, %155, %cst_96 [1] : vector<32x256xf32> to vector<32xf32>
    %157 = vector.shape_cast %156 : vector<32xf32> to vector<32x1xf32>
    %cst_97 = arith.constant 3.906250e-03 : f32
    %158 = vector.broadcast %cst_97 : f32 to vector<32x1xf32>
    %159 = arith.mulf %157, %158 : vector<32x1xf32>
    %cst_98 = arith.constant 9.99999974E-6 : f32
    %160 = vector.broadcast %cst_98 : f32 to vector<32x1xf32>
    %161 = arith.addf %159, %160 : vector<32x1xf32>
    %162 = math.rsqrt %161 : vector<32x1xf32>
    %163 = vector.broadcast %162 : vector<32x1xf32> to vector<32x256xf32>
    %164 = arith.mulf %154, %163 : vector<32x256xf32>
    %165 = vector.broadcast %147 : vector<32x1xf32> to vector<32x256xf32>
    %166 = arith.mulf %164, %165 : vector<32x256xf32>
    %167 = vector.broadcast %148 : vector<32x1xf32> to vector<32x256xf32>
    %168 = arith.addf %166, %167 : vector<32x256xf32>
    %169 = vector.extract_strided_slice %168 {offsets = [0, 0], sizes = [16, 256], strides = [1, 1]} : vector<32x256xf32> to vector<16x256xf32>
    %170 = vector.extract_strided_slice %168 {offsets = [16, 0], sizes = [16, 256], strides = [1, 1]} : vector<32x256xf32> to vector<16x256xf32>
    %cst_99 = arith.constant dense<0.000000e+00> : vector<16xf32>
    %171 = vector.multi_reduction <add>, %169, %cst_99 [1] : vector<16x256xf32> to vector<16xf32>
    %172 = vector.shape_cast %171 : vector<16xf32> to vector<16x1xf32>
    %cst_100 = arith.constant 3.906250e-03 : f32
    %173 = vector.broadcast %cst_100 : f32 to vector<16x1xf32>
    %174 = arith.mulf %172, %173 : vector<16x1xf32>
    %175 = vector.extract_strided_slice %0 {offsets = [0, 4], sizes = [16, 1], strides = [1, 1]} : vector<32x10xf32> to vector<16x1xf32>
    %176 = arith.mulf %175, %174 : vector<16x1xf32>
    %177 = vector.extract_strided_slice %0 {offsets = [0, 5], sizes = [16, 1], strides = [1, 1]} : vector<32x10xf32> to vector<16x1xf32>
    %178 = arith.addf %176, %177 : vector<16x1xf32>
    %179 = arith.negf %178 : vector<16x1xf32>
    %180 = math.exp %179 : vector<16x1xf32>
    %cst_101 = arith.constant 1.000000e+00 : f32
    %181 = vector.broadcast %cst_101 : f32 to vector<16x1xf32>
    %182 = arith.addf %181, %180 : vector<16x1xf32>
    %183 = arith.divf %181, %182 : vector<16x1xf32>
    %184 = vector.broadcast %183 : vector<16x1xf32> to vector<16x256xf32>
    %185 = arith.mulf %169, %184 : vector<16x256xf32>
    %cst_102 = arith.constant dense<0.000000e+00> : vector<16xf32>
    %186 = vector.multi_reduction <add>, %170, %cst_102 [1] : vector<16x256xf32> to vector<16xf32>
    %187 = vector.shape_cast %186 : vector<16xf32> to vector<16x1xf32>
    %cst_103 = arith.constant 3.906250e-03 : f32
    %188 = vector.broadcast %cst_103 : f32 to vector<16x1xf32>
    %189 = arith.mulf %187, %188 : vector<16x1xf32>
    %190 = vector.broadcast %189 : vector<16x1xf32> to vector<16x256xf32>
    %191 = arith.subf %170, %190 : vector<16x256xf32>
    %192 = arith.mulf %191, %191 : vector<16x256xf32>
    %cst_104 = arith.constant dense<0.000000e+00> : vector<16xf32>
    %193 = vector.multi_reduction <add>, %192, %cst_104 [1] : vector<16x256xf32> to vector<16xf32>
    %194 = vector.shape_cast %193 : vector<16xf32> to vector<16x1xf32>
    %cst_105 = arith.constant 3.906250e-03 : f32
    %195 = vector.broadcast %cst_105 : f32 to vector<16x1xf32>
    %196 = arith.mulf %194, %195 : vector<16x1xf32>
    %197 = vector.extract_strided_slice %0 {offsets = [0, 8], sizes = [16, 1], strides = [1, 1]} : vector<32x10xf32> to vector<16x1xf32>
    %cst_106 = arith.constant 9.99999974E-6 : f32
    %198 = vector.broadcast %cst_106 : f32 to vector<16x1xf32>
    %199 = arith.addf %196, %198 : vector<16x1xf32>
    %200 = math.rsqrt %199 : vector<16x1xf32>
    %201 = vector.broadcast %200 : vector<16x1xf32> to vector<16x256xf32>
    %202 = arith.mulf %191, %201 : vector<16x256xf32>
    %203 = vector.broadcast %197 : vector<16x1xf32> to vector<16x256xf32>
    %204 = arith.mulf %203, %202 : vector<16x256xf32>
    %205 = vector.extract_strided_slice %0 {offsets = [0, 9], sizes = [16, 1], strides = [1, 1]} : vector<32x10xf32> to vector<16x1xf32>
    %206 = vector.broadcast %205 : vector<16x1xf32> to vector<16x256xf32>
    %207 = arith.addf %204, %206 : vector<16x256xf32>
    %208 = vector.extract_strided_slice %0 {offsets = [0, 6], sizes = [16, 1], strides = [1, 1]} : vector<32x10xf32> to vector<16x1xf32>
    %209 = vector.broadcast %208 : vector<16x1xf32> to vector<16x256xf32>
    %210 = arith.mulf %209, %207 : vector<16x256xf32>
    %211 = vector.extract_strided_slice %0 {offsets = [0, 7], sizes = [16, 1], strides = [1, 1]} : vector<32x10xf32> to vector<16x1xf32>
    %212 = vector.broadcast %211 : vector<16x1xf32> to vector<16x256xf32>
    %213 = arith.addf %210, %212 : vector<16x256xf32>
    %214 = arith.negf %213 : vector<16x256xf32>
    %215 = math.exp %214 : vector<16x256xf32>
    %cst_107 = arith.constant 1.000000e+00 : f32
    %216 = vector.broadcast %cst_107 : f32 to vector<16x256xf32>
    %217 = arith.addf %216, %215 : vector<16x256xf32>
    %218 = arith.divf %216, %217 : vector<16x256xf32>
    %219 = arith.mulf %170, %218 : vector<16x256xf32>
    %c0_108 = arith.constant 0 : index
    %c0_109 = arith.constant 0 : index
    %220 = vector.load %arg5[%c0_108, %c0_109] : memref<32x32xf32, #tpu.memory_space<vmem>>, vector<32x16xf32>
    %cst_110 = arith.constant dense<0.000000e+00> : vector<32x256xf32>
    %221 = tpu.matmul %220, %185, %cst_110 {dimension_numbers = #tpu.dot_dimension_numbers<[1], [0], [0], [1], [0, 0, 1, 1], [], []>} : vector<32x16xf32>, vector<16x256xf32>, vector<32x256xf32> -> vector<32x256xf32>
    %c0_111 = arith.constant 0 : index
    %c16_112 = arith.constant 16 : index
    %222 = vector.load %arg5[%c0_111, %c16_112] : memref<32x32xf32, #tpu.memory_space<vmem>>, vector<32x16xf32>
    %cst_113 = arith.constant dense<0.000000e+00> : vector<32x256xf32>
    %223 = tpu.matmul %222, %219, %cst_113 {dimension_numbers = #tpu.dot_dimension_numbers<[1], [0], [0], [1], [0, 0, 1, 1], [], []>} : vector<32x16xf32>, vector<16x256xf32>, vector<32x256xf32> -> vector<32x256xf32>
    %224 = arith.addf %221, %223 : vector<32x256xf32>
    %cst_114 = arith.constant 0.000000e+00 : f32
    %225 = vector.broadcast %cst_114 : f32 to vector<32x256xf32>
    %226 = arith.cmpf oge, %224, %225 : vector<32x256xf32>
    %cst_115 = arith.constant 0.00999999977 : f32
    %227 = vector.broadcast %cst_115 : f32 to vector<32x256xf32>
    %228 = arith.mulf %227, %224 : vector<32x256xf32>
    %229 = arith.select %226, %224, %228 : vector<32x256xi1>, vector<32x256xf32>
    %c0_116 = arith.constant 0 : index
    %c0_117 = arith.constant 0 : index
    %c0_118 = arith.constant 0 : index
    %230 = vector.load %arg6[%c0_116, %c0_117, %c0_118] : memref<1x32x256xf32, #tpu.memory_space<vmem>>, vector<1x32x256xf32>
    %231 = vector.shape_cast %230 : vector<1x32x256xf32> to vector<32x256xf32>
    %232 = vector.shape_cast %229 : vector<32x256xf32> to vector<1x32x256xf32>
    tpu.vector_store %arg6[%c0_116, %c0_117, %c0_118], %232 {strides = array<i32>} : memref<1x32x256xf32, #tpu.memory_space<vmem>>, vector<1x32x256xf32>,
    return
  }
  func.func @transform_0(%arg0: i32) -> (i32, i32, i32) {
    %c0_i32 = arith.constant 0 : i32
    %c0_i32_0 = arith.constant 0 : i32
    %c0_i32_1 = arith.constant 0 : i32
    return %arg0, %c0_i32, %c0_i32_0 : i32, i32, i32
  }
  func.func @transform_1(%arg0: i32) -> (i32, i32) {
    %c0_i32 = arith.constant 0 : i32
    %c0_i32_0 = arith.constant 0 : i32
    %c0_i32_1 = arith.constant 0 : i32
    return %c0_i32, %c0_i32_0 : i32, i32
  }
  func.func @transform_2(%arg0: i32) -> (i32, i32) {
    %c0_i32 = arith.constant 0 : i32
    %c0_i32_0 = arith.constant 0 : i32
    %c0_i32_1 = arith.constant 0 : i32
    return %c0_i32, %c0_i32_0 : i32, i32
  }
  func.func @transform_3(%arg0: i32) -> (i32, i32) {
    %c0_i32 = arith.constant 0 : i32
    %c0_i32_0 = arith.constant 0 : i32
    %c0_i32_1 = arith.constant 0 : i32
    return %c0_i32, %c0_i32_0 : i32, i32
  }
  func.func @transform_4(%arg0: i32) -> (i32, i32) {
    %c0_i32 = arith.constant 0 : i32
    %c0_i32_0 = arith.constant 0 : i32
    %c0_i32_1 = arith.constant 0 : i32
    return %c0_i32, %c0_i32_0 : i32, i32
  }
  func.func @transform_5(%arg0: i32) -> (i32, i32, i32) {
    %c0_i32 = arith.constant 0 : i32
    %c0_i32_0 = arith.constant 0 : i32
    %c0_i32_1 = arith.constant 0 : i32
    return %arg0, %c0_i32, %c0_i32_0 : i32, i32, i32
  }
}

</mosaic_0001>

<bundles_post_ra>
// kernel: shuffle_att_stacked_conv_blocks.1
= control target key start
LH: loop header
LB: loop body
LE: loop exit
PB: predicated region body
PF: predicated region fallthrough
CT: control target
= control target key end

     0   :  { %s2532_s18 = smov 0   ;;  %s3462_s0 = inlined_call_operand.vmem [shape: f32[2,4,256], index: 0, kind: input, shape index: {}]   ;;  %s3463_s1 = inlined_call_operand.vmem [shape: f32[32,36], index: 1, kind: input, shape index: {}]   ;;  %s3464_s2 = inlined_call_operand.vmem [shape: f32[32,288], index: 2, kind: input, shape index: {}]   ;;  %s3465_s3 = inlined_call_operand.vmem [shape: f32[32,10], index: 3, kind: input, shape index: {}]   ;;  %s3466_s4 = inlined_call_operand.vmem [shape: f32[32,32], index: 4, kind: input, shape index: {}]   ;;  %s3467_s5 = inlined_call_operand.vmem [shape: f32[2,32,256], index: 5, kind: output, shape index: {}]  }
   0x1 LB: > { %s2215_s19 = sadd.s32 4294967295, %s2482_s18   ;;  %p2219_p0 = scmp.ge.s32.totalorder %s2482_s18, 1  ;;  %s2482_s18 = sphi %s2532_s18, %s15_s18  }
   0x2   : > { %p187_p1 = scmp.lt.s32.totalorder %s2482_s18, 3 }
   0x4   : > { %p188_p2 = pnand %p2219_p0, %p187_p1 }
   0x6   : > { %191 = sbr.rel (%p188_p2) target bundleno = 2138 (0x85a), region = 40 }
   0xb   : > { %v2484_v0 = vmov 0.0   ;;  %p215_p3 = scmp.lt.s32.totalorder %s2215_s19, 1  ;;  %s2485_s24 = smov 111   ;;  %v229_v35 = vlaneseq  ;;  %vm389_vm0 = vcmask 1039360   ;;  %vm459_vm3 = vcmask 908288   ;;  %v1382_v47 = vld [vmem:[%s3464_s2 + $0x18] sm:$0xff] }
   0xc   : > { %264 = vst [vmem:[#allocation2 + $0x28] sm:$0xff] %v2484_v0  ;;  %260 = vst [vmem:[#allocation2 + $0x58] sm:$0xff] %v2484_v0  ;;  %566 = vmatprep.mubr.f32.mxu0 %v2484_v0  ;;  %s2486_s25 = smov 127   ;;  %s2487_s26 = smov 113   ;;  %vm416_vm4 = vcmask 924672   ;;  %vm440_vm7 = vcmask 916480  }
   0xd   : > { %s3485_s19 = smov (!%p215_p3, %s2215_s19), 1  ;;  %s2488_s27 = smov 112   ;;  %v230_v37 = vand.u32 127, %v229_v35  ;;  %vm495_vm8 = vcmask 1043456   ;;  %vm358_vm9 = vcmask 7168   ;;  %vm337_vm10 = vcmask 121856  }
   0xe   : > { %s2250_s20 = sshll.u32 %s3485_s19, 3  ;;  %s2489_s28 = smov 1   ;;  %vm290_vm11 = vcmask 138240   ;;  %vm314_vm12 = vcmask 130048   ;;  %vm482_vm13 = vcmask 293888   ;;  %v1386_v46 = vld [vmem:[%s3464_s2 + $0x38] sm:$0xff] }
   0xf   : > { %s219_s23 = scalar_lea.vmem %s3462_s0, %s2250_s20  ;;  %s2490_s29 = smov 15   ;;  %v231_v39 = vadd.s32 128, %v230_v37  ;;  %v236_v42 = vand.u32 15, %v230_v37 }
  0x10   : > { %v268_v1 = vld [vmem:[%s219_s23] sm:$0xff]  ;;  %s2491_s30 = smov 17   ;;  %s2492_s6 = smov 16  }
  0x11   : > { %272 = vst [vmem:[#allocation2 + $0x8] sm:$0xf] %v268_v1  ;;  %v270_v3 = vcombine.high %v268_v1, %v268_v1  ;;  %v243_v43 = vand.u32 15, %v231_v39  ;;  %vm2573_vm1 = vcmp.le.s32.totalorder %v236_v42, 14  ;;  %vm2583_vm5 = vcmp.ge.s32.totalorder %v236_v42, 1 }
  0x13   : > { %v449_v2 = vld [vmem:[#allocation2 + $0x28] sm:$0xf]  ;;  %273 = vst [vmem:[#allocation2 + $0x18] sm:$0xf] %v270_v3  ;;  %v346_v21 = vld [vmem:[#allocation2 + $0x58] sm:$0xf] }
  0x14   : > { %457 = vrot.lane.b32.xlu0 %v449_v2, %s2485_s24  ;;  %v379_v4 = vld [vmem:[#allocation2 + $0x28] sm:$0xf]  ;;  %v321_v26 = vld [vmem:[#allocation2 + $0x58] sm:$0xf]  ;;  %vm2577_vm2 = vcmp.le.s32.totalorder %v243_v43, 14  ;;  %vm2587_vm6 = vcmp.ge.s32.totalorder %v243_v43, 1 }
  0x15   : > { %v406_v5 = vld [vmem:[#allocation2 + $0x28] sm:$0xf]  ;;  %v274_v27 = vld [vmem:[#allocation2 + $0x58] sm:$0xf] }
  0x16   : > { %v427_v12 = vld [vmem:[#allocation2 + $0x28] sm:$0xf]  ;;  %v299_v33 = vld [vmem:[#allocation2 + $0x58] sm:$0xf] }
  0x17   : > { %v433_v15 = vrot.slane %v427_v12, 4  ;;  %v305_v34 = vrot.slane %v299_v33, 4 }
  0x18   : > { %387 = vrot.lane.b32.xlu0 %v379_v4, %s2486_s25  ;;  %v447_v6 = vld [vmem:[#allocation2 + $0x8] sm:$0xf] }
  0x19   : > { %453 = vrot.lane.b32.xlu1 %v447_v6, %s2485_s24  ;;  %v377_v7 = vld [vmem:[#allocation2 + $0x8] sm:$0xf] }
  0x1a   : > { %v404_v8 = vld [vmem:[#allocation2 + $0x8] sm:$0xf]  ;;  %v378_v9 = vld [vmem:[#allocation2 + $0x18] sm:$0xf] }
  0x1b   : > { %v374_v10 = vld [vmem:[#allocation2 + $0x18] sm:$0xf]  ;;  %v373_v13 = vld [vmem:[#allocation2 + $0x8] sm:$0xf] }
  0x1c   : > { %414 = vrot.lane.b32.xlu0 %v406_v5, %s2487_s26  ;;  %v448_v11 = vld [vmem:[#allocation2 + $0x18] sm:$0xf]  ;;  %376 = vst [vmem:[#allocation3 + $0xf8] sm:$0xf] %v374_v10  ;;  %375 = vst [vmem:[#allocation3 + $0x78] sm:$0xf] %v373_v13 }
  0x1d   : > { %383 = vrot.lane.b32.xlu1 %v377_v7, %s2486_s25  ;;  %v405_v14 = vld [vmem:[#allocation2 + $0x18] sm:$0xf]  ;;  %v347_v19 = vld [vmem:[#allocation2 + $0x8] sm:$0xf] }
  0x1e   : > { %v426_v16 = vld [vmem:[#allocation2 + $0x18] sm:$0xf]  ;;  %v425_v20 = vld [vmem:[#allocation2 + $0x8] sm:$0xf] }
  0x1f   : > { %v432_v17 = vrot.slane %v426_v16, 4  ;;  %v348_v18 = vld [vmem:[#allocation2 + $0x18] sm:$0xf]  ;;  %v431_v22 = vrot.slane %v425_v20, 4  ;;  %v322_v24 = vld [vmem:[#allocation2 + $0x8] sm:$0xf] }
  0x20   : > { %410 = vrot.lane.b32.xlu0 %v404_v8, %s2487_s26  ;;  %v323_v23 = vld [vmem:[#allocation2 + $0x18] sm:$0xf]  ;;  %v275_v25 = vld [vmem:[#allocation2 + $0x8] sm:$0xf] }
  0x21   : > { %385 = vrot.lane.b32.xlu1 %v378_v9, %s2486_s25  ;;  %v301_v28 = vld [vmem:[#allocation2 + $0x18] sm:$0xf]  ;;  %v300_v31 = vld [vmem:[#allocation2 + $0x8] sm:$0xf] }
  0x22   : > { %v276_v29 = vld [vmem:[#allocation2 + $0x18] sm:$0xf]  ;;  %v307_v30 = vrot.slane %v301_v28, 4  ;;  %v306_v32 = vrot.slane %v300_v31, 4 }
  0x24   : > { %455 = vrot.lane.b32.xlu0 %v448_v11, %s2485_s24 }
  0x25   : > { %412 = vrot.lane.b32.xlu1 %v405_v14, %s2487_s26 }
  0x28   : > { %438 = vrot.lane.b32.xlu0 %v433_v15, %s2488_s27 }
  0x29   : > { %436 = vrot.lane.b32.xlu1 %v432_v17, %s2488_s27 }
  0x2c   : > { %356 = vrot.lane.b32.xlu0 %v348_v18, %s2489_s28 }
  0x2d   : > { %354 = vrot.lane.b32.xlu1 %v347_v19, %s2489_s28 }
  0x30   : > { %352 = vrot.lane.b32.xlu0 %v346_v21, %s2489_s28 }
  0x31   : > { %434 = vrot.lane.b32.xlu1 %v431_v22, %s2488_s27 }
  0x34   : > { %335 = vrot.lane.b32.xlu0 %v323_v23, %s2490_s29 }
  0x35   : > { %333 = vrot.lane.b32.xlu1 %v322_v24, %s2490_s29 }
  0x38   : > { %286 = vrot.lane.b32.xlu0 %v275_v25, %s2491_s30 }
  0x39   : > { %331 = vrot.lane.b32.xlu1 %v321_v26, %s2490_s29 }
  0x3c   : > { %284 = vrot.lane.b32.xlu0 %v274_v27, %s2491_s30 }
  0x3d   : > { %288 = vrot.lane.b32.xlu1 %v276_v29, %s2491_s30 }
  0x40   : > { %312 = vrot.lane.b32.xlu0 %v307_v30, %s2492_s6 }
  0x41   : > { %310 = vrot.lane.b32.xlu1 %v306_v32, %s2492_s6 }
  0x45   : > { %308 = vrot.lane.b32.xlu1 %v305_v34, %s2492_s6 }
  0x86   : > { %v458_v36 = vpop.permute.xlu0 %457 }
  0x8a   : > { %v388_v38 = vpop.permute.xlu0 %387 }
  0x8b   : > { %v454_v40 = vpop.permute.xlu1 %453 }
  0x8e   : > { %v415_v41 = vpop.permute.xlu0 %414 }
  0x8f   : > { %v384_v44 = vpop.permute.xlu1 %383 }
  0x92   : > { %v411_v45 = vpop.permute.xlu0 %410 }
  0x93   : > { %v386_v48 = vpop.permute.xlu1 %385 }
  0x94   : > { %v390_v49 = vsel %vm389_vm0, %v384_v44, %v386_v48  ;;  %v391_v50 = vsel %vm389_vm0, %v386_v48, %v388_v38  ;;  %v468_v48 = vld [vmem:[%s3463_s1] sm:$0xff] }
  0x95   : > { %v394_v54 = vsel %vm2573_vm1, %v390_v49, 0.0  ;;  %v395_v55 = vsel %vm2577_vm2, %v391_v50, 0.0  ;;  %v469_v50 = vld [vmem:[%s3463_s1 + $0x8] sm:$0xff] }
  0x96   : > { %v456_v51 = vpop.permute.xlu0 %455  ;;  %v398_v58 = vrot.slane %v394_v54, 4  ;;  %v399_v59 = vrot.slane %v395_v55, 4  ;;  %v471_v54 = vld [vmem:[%s3463_s1 + $0x18] sm:$0xff]  ;;  %v2493_v55 = vmov 0  }
  0x97   : > { %v460_v56 = vsel %vm459_vm3, %v454_v40, %v456_v51  ;;  %v461_v57 = vsel %vm459_vm3, %v456_v51, %v458_v36  ;;  %v413_v62 = vpop.permute.xlu1 %412  ;;  %v470_v51 = vld [vmem:[%s3463_s1 + $0x10] sm:$0xff]  ;;  %2278 = vset.pattern.permute.xlu1 %v2493_v55  ;;  %2279 = vset.pattern.permute.xlu0 %v2493_v55 }
  0x98   : > { %v464_v60 = vsel %vm2573_vm1, %v460_v56, 0.0  ;;  %v465_v61 = vsel %vm2577_vm2, %v461_v57, 0.0  ;;  %402 = vst [vmem:[#allocation3 + $0x78] sm:$0xf0] %v398_v58  ;;  %403 = vst [vmem:[#allocation3 + $0xf8] sm:$0xf0] %v399_v59  ;;  %v417_v63 = vsel %vm416_vm4, %v411_v45, %v413_v62  ;;  %v418_v1 = vsel %vm416_vm4, %v413_v62, %v415_v41 }
  0x99   : > { %466 = vst [vmem:[#allocation3 + $0x28] sm:$0xf] %v464_v60  ;;  %467 = vst [vmem:[#allocation3 + $0x90] sm:$0xf] %v465_v61  ;;  %v421_v3 = vsel %vm2583_vm5, %v417_v63, 0.0  ;;  %v422_v4 = vsel %vm2587_vm6, %v418_v1, 0.0 }
  0x9a   : > { %v439_v2 = vpop.permute.xlu0 %438  ;;  %423 = vst [vmem:[#allocation3 + $0x1b8] sm:$0xf] %v421_v3  ;;  %424 = vst [vmem:[#allocation3 + $0x38] sm:$0xf] %v422_v4 }
  0x9b   : > { %v437_v5 = vpop.permute.xlu1 %436 }
  0x9c   : > { %v442_v6 = vsel %vm440_vm7, %v437_v5, %v439_v2 }
  0x9d   : > { %446 = vst [vmem:[#allocation3 + $0x38] sm:$0xf0] %v442_v6  ;;  %v2494_v6 = vmov 1  }
  0x9e   : > { %v357_v7 = vpop.permute.xlu0 %356 }
  0x9f   : > { %v355_v10 = vpop.permute.xlu1 %354  ;;  %v477_v31 = vld [vmem:[#allocation3 + $0xf8] sm:$0xff] }
  0xa0   : > { %v481_v8 = vld [vmem:[#allocation3 + $0x90] sm:$0xf]  ;;  %v480_v9 = vld [vmem:[#allocation3 + $0x28] sm:$0xf]  ;;  %v360_v11 = vsel %vm358_vm9, %v355_v10, %v357_v7  ;;  %v476_v34 = vld [vmem:[#allocation3 + $0x78] sm:$0xff] }
  0xa1   : > { %2224 = vmatprep.subr.msk.mxu0 %vm495_vm8, %v481_v8  ;;  %v364_v13 = vsel %vm2587_vm6, %v360_v11, 0.0  ;;  %v226_v7 = vld [vmem:[%s3465_s3 + $0x8] sm:$0xff]  ;;  %v227_v8 = vld [vmem:[%s3465_s3 + $0x10] sm:$0xff] }
  0xa2   : > { %2225 = vmatpush1.msk.msra.mxu0 %vm495_vm8, %v480_v9  ;;  %v353_v12 = vpop.permute.xlu0 %352  ;;  %v368_v15 = vrot.slane %v364_v13, 4  ;;  %v225_v9 = vld [vmem:[%s3465_s3] sm:$0xff] }
  0xa3   : > { %v359_v14 = vsel %vm358_vm9, %v353_v12, %v355_v10  ;;  %v435_v18 = vpop.permute.xlu1 %434 }
  0xa4   : > { %v363_v16 = vsel %vm2583_vm5, %v359_v14, 0.0  ;;  %372 = vst [vmem:[#allocation3 + $0x1d8] sm:$0xf0] %v368_v15  ;;  %v441_v19 = vsel %vm440_vm7, %v435_v18, %v437_v5  ;;  %v479_v20 = vld [vmem:[#allocation3 + $0x38] sm:$0xff] }
  0xa5   : > { %v367_v17 = vrot.slane %v363_v16, 4  ;;  %445 = vst [vmem:[#allocation3 + $0x1b8] sm:$0xf0] %v441_v19  ;;  %526 = vmatprep.subr.mxu0 %v479_v20  ;;  %v228_v5 = vld [vmem:[%s3465_s3 + $0x18] sm:$0xff] }
  0xa6   : > { %v336_v21 = vpop.permute.xlu0 %335 }
  0xa7   : > { %371 = vst [vmem:[#allocation3 + $0xc0] sm:$0xf0] %v367_v17  ;;  %v334_v22 = vpop.permute.xlu1 %333 }
  0xa8   : > { %v339_v23 = vsel %vm337_vm10, %v334_v22, %v336_v21 }
  0xa9   : > { %v343_v25 = vsel %vm2577_vm2, %v339_v23, 0.0 }
  0xaa   : > { %v287_v24 = vpop.permute.xlu0 %286  ;;  %345 = vst [vmem:[#allocation3 + $0x1d8] sm:$0xf] %v343_v25 }
  0xab   : > { %v332_v26 = vpop.permute.xlu1 %331 }
  0xac   : > { %v338_v27 = vsel %vm337_vm10, %v332_v26, %v334_v22  ;;  %v478_v28 = vld [vmem:[#allocation3 + $0x1b8] sm:$0xff] }
  0xad   : > { %v342_v30 = vsel %vm2573_vm1, %v338_v27, 0.0  ;;  %527 = vmatpush1.msra.mxu0 %v478_v28 }
  0xae   : > { %v285_v29 = vpop.permute.xlu0 %284  ;;  %344 = vst [vmem:[#allocation3 + $0xc0] sm:$0xf] %v342_v30  ;;  %528 = vmatprep.subr.mxu0 %v477_v31 }
  0xaf   : > { %v291_v32 = vsel %vm290_vm11, %v285_v29, %v287_v24  ;;  %529 = vmatpush1.msra.mxu0 %v476_v34  ;;  %v289_v35 = vpop.permute.xlu1 %288 }
  0xb0   : > { %v295_v33 = vsel %vm2583_vm5, %v291_v32, 0.0  ;;  %v292_v36 = vsel %vm290_vm11, %v287_v24, %v289_v35 }
  0xb1   : > { %297 = vst [vmem:[#allocation3 + $0x100] sm:$0xf] %v295_v33  ;;  %v296_v37 = vsel %vm2587_vm6, %v292_v36, 0.0  ;;  %v475_v38 = vld [vmem:[#allocation3 + $0x1d8] sm:$0xff] }
  0xb2   : > { %v313_v39 = vpop.permute.xlu0 %312  ;;  %298 = vst [vmem:[#allocation3 + $0x110] sm:$0xf] %v296_v37  ;;  %530 = vmatprep.subr.mxu0 %v475_v38 }
  0xb3   : > { %v311_v40 = vpop.permute.xlu1 %310 }
  0xb4   : > { %v316_v41 = vsel %vm314_vm12, %v311_v40, %v313_v39 }
  0xb5   : > { %320 = vst [vmem:[#allocation3 + $0x110] sm:$0xf0] %v316_v41  ;;  %v474_v42 = vld [vmem:[#allocation3 + $0xc0] sm:$0xff] }
  0xb6   : > { %531 = vmatpush1.msra.mxu0 %v474_v42 }
  0xb7   : > { %v309_v43 = vpop.permute.xlu1 %308 }
  0xb8   : > { %v315_v44 = vsel %vm314_vm12, %v309_v43, %v311_v40 }
  0xb9   : > { %319 = vst [vmem:[#allocation3 + $0x100] sm:$0xf0] %v315_v44 }
  0xbc   : > { %v473_v45 = vld [vmem:[#allocation3 + $0x110] sm:$0xff] }
  0xbd   : > { %532 = vmatprep.subr.mxu0 %v473_v45 }
  0xc0   : > { %v472_v49 = vld [vmem:[#allocation3 + $0x100] sm:$0xff] }
  0xc1   : > { %533 = vmatpush1.msra.mxu0 %v472_v49 }
  0xc2   : > { %2226 = vmatmul.mubr.msk.f32.vlgmr.msra.gmra.mxu0 %vm482_vm13, %v468_v48 }
  0xc3   : > { %572 = vmatprep.mubr.f32.mxu0 %v2484_v0 }
  0xc6   : > { %2227 = vmatmul.mubr.msk.f32.gmra.mxu0 %vm482_vm13, %v469_v50 }
  0xc7   : > { %578 = vmatprep.mubr.f32.mxu0 %v2484_v0 }
  0xca   : > { %2228 = vmatmul.mubr.msk.f32.gmra.mxu0 %vm482_vm13, %v470_v51 }
  0xcb   : > { %584 = vmatprep.mubr.f32.mxu0 %v2484_v0 }
  0xce   : > { %2229 = vmatmul.mubr.msk.f32.gmra.mxu0 %vm482_vm13, %v471_v54 }
  0xcf   : > { %1629 = vmatprep.mubr.f32.mxu0 %v2484_v0 }
 0x182   : > { %v2645_v56 = vpop.f32.mrf.mxu0 }
 0x184   : > { %v2647_v57 = vpop.f32.mrf.mxu0 }
 0x185   : > { %v591_v4 = vadd.f32 %v2647_v57, %v2645_v56 }
 0x186   : > { %v574_v58 = vpop.f32.mrf.mxu0 }
 0x188   : > { %v576_v59 = vpop.f32.mrf.mxu0 }
 0x189   : > { %v594_v60 = vadd.f32 %v576_v59, %v574_v58 }
 0x18a   : > { %v580_v61 = vpop.f32.mrf.mxu0 }
 0x18b   : > { %595 = vadd.xlane.f32.xlu0 %v594_v60 }
 0x18c   : > { %v582_v62 = vpop.f32.mrf.mxu0 }
 0x18d   : > { %v597_v63 = vadd.f32 %v582_v62, %v580_v61 }
 0x18e   : > { %v586_v1 = vpop.f32.mrf.mxu0 }
 0x18f   : > { %598 = vadd.xlane.f32.xlu1 %v597_v63 }
 0x190   : > { %v588_v2 = vpop.f32.mrf.mxu0 }
 0x191   : > { %v600_v3 = vadd.f32 %v588_v2, %v586_v1 }
 0x193   : > { %601 = vadd.xlane.f32.xlu0 %v600_v3 }
 0x197   : > { %592 = vadd.xlane.f32.xlu0 %v591_v4 }
 0x1a0   : > { %672 = vperm.xlu1 %2278, %v228_v5  }
 0x1a4   : > { %2280 = vset.pattern.permute.xlu1 %v2494_v6 }
 0x1a5   : > { %696 = vperm.xlu1 %2280, %v228_v5  }
 0x1a9   : > { %2281 = vset.pattern.permute.xlu1 %v2493_v55 }
 0x1aa   : > { %662 = vperm.xlu1 %2281, %v226_v7  }
 0x1ad   : > { %667 = vperm.xlu0 %2279, %v227_v8  }
 0x1ae   : > { %2282 = vset.pattern.permute.xlu1 %v2494_v6 }
 0x1af   : > { %692 = vperm.xlu1 %2282, %v227_v8  }
 0x1b1   : > { %2286 = vrot.lane.b32.xlu0 %v2484_v0, %s2489_s28 }
 0x1b3   : > { %2283 = vset.pattern.permute.xlu1 %v2493_v55 }
 0x1b4   : > { %657 = vperm.xlu1 %2283, %v225_v9  }
 0x1b5   : > { %2296 = vrot.lane.b32.xlu0 %v2484_v0, %s2490_s29 }
 0x1b8   : > { %2284 = vset.pattern.permute.xlu1 %v2494_v6 }
 0x1b9   : > { %688 = vperm.xlu1 %2284, %v226_v7   ;;  %2306 = vrot.lane.b32.xlu0 %v2484_v0, %s2492_s6 }
 0x1bd   : > { %684 = vperm.xlu1 %2284, %v225_v9   ;;  %2316 = vrot.lane.b32.xlu0 %v2484_v0, %s2491_s30 }
 0x1c1   : > { %2291 = vrot.lane.b32.xlu1 %v2484_v0, %s2489_s28 }
 0x1c5   : > { %2301 = vrot.lane.b32.xlu1 %v2484_v0, %s2490_s29 }
 0x1c9   : > { %2311 = vrot.lane.b32.xlu1 %v2484_v0, %s2492_s6 }
 0x1cd   : > { %2321 = vrot.lane.b32.xlu1 %v2484_v0, %s2491_s30 }
 0x1d1   : > { %2326 = vrot.lane.b32.xlu1 %v2484_v0, %s2488_s27 }
 0x214   : > { %v596_v10 = vpop.xlane.xlu0 %595 }
 0x215   : > { %v604_v11 = vmul.f32 0.00390625, %v596_v10 }
 0x217   : > { %v2681_v12 = vsub.f32 %v574_v58, %v604_v11  ;;  %v2683_v13 = vsub.f32 %v576_v59, %v604_v11 }
 0x218   : > { %v599_v16 = vpop.xlane.xlu1 %598 }
 0x219   : > { %v617_v14 = vmul.f32 %v2681_v12, %v2681_v12  ;;  %v618_v15 = vmul.f32 %v2683_v13, %v2683_v13  ;;  %v605_v20 = vmul.f32 0.00390625, %v599_v16 }
 0x21b   : > { %v626_v17 = vadd.f32 %v618_v15, %v617_v14  ;;  %v2697_v27 = vsub.f32 %v580_v61, %v605_v20  ;;  %v2699_v28 = vsub.f32 %v582_v62, %v605_v20 }
 0x21c   : > { %v602_v18 = vpop.xlane.xlu0 %601  ;;  %v673_v38 = vpop.permute.xlu1 %672 }
 0x21d   : > { %v606_v19 = vmul.f32 0.00390625, %v602_v18  ;;  %627 = vadd.xlane.f32.xlu1 %v626_v17  ;;  %v619_v35 = vmul.f32 %v2697_v27, %v2697_v27  ;;  %v620_v36 = vmul.f32 %v2699_v28, %v2699_v28 }
 0x21f   : > { %v2689_v21 = vsub.f32 %v586_v1, %v606_v19  ;;  %v2691_v22 = vsub.f32 %v588_v2, %v606_v19  ;;  %v629_v37 = vadd.f32 %v620_v36, %v619_v35 }
 0x220   : > { %v593_v23 = vpop.xlane.xlu0 %592  ;;  %v697_v39 = vpop.permute.xlu1 %696 }
 0x221   : > { %v603_v24 = vmul.f32 0.00390625, %v593_v23  ;;  %v621_v25 = vmul.f32 %v2689_v21, %v2689_v21  ;;  %v622_v26 = vmul.f32 %v2691_v22, %v2691_v22 }
 0x223   : > { %v2702_v29 = vsub.f32 %v2645_v56, %v603_v24  ;;  %v2705_v30 = vsub.f32 %v2647_v57, %v603_v24  ;;  %v632_v31 = vadd.f32 %v622_v26, %v621_v25 }
 0x225   : > { %633 = vadd.xlane.f32.xlu1 %v632_v31  ;;  %v615_v32 = vmul.f32 %v2702_v29, %v2702_v29  ;;  %v616_v33 = vmul.f32 %v2705_v30, %v2705_v30  ;;  %v663_v40 = vpop.permute.xlu1 %662 }
 0x227   : > { %v623_v34 = vadd.f32 %v616_v33, %v615_v32 }
 0x228   : > { %v2729_v49 = vpop.permute.xlu0 %667 }
 0x229   : > { %624 = vadd.xlane.f32.xlu0 %v623_v34 }
 0x22a   : > { %v2721_v41 = vpop.permute.xlu1 %692 }
 0x22c   : > { %v2733_v51 = vpop.permute.xlu0 %2286 }
 0x22d   : > { %630 = vadd.xlane.f32.xlu0 %v629_v37 }
 0x22f   : > { %v658_v42 = vpop.permute.xlu1 %657 }
 0x230   : > { %v2737_v55 = vpop.permute.xlu0 %2296 }
 0x234   : > { %v689_v43 = vpop.permute.xlu1 %688  ;;  %v2741_v59 = vpop.permute.xlu0 %2306 }
 0x238   : > { %v2723_v44 = vpop.permute.xlu1 %684  ;;  %v2743_v61 = vpop.permute.xlu0 %2316 }
 0x23c   : > { %v2725_v45 = vpop.permute.xlu1 %2291 }
 0x240   : > { %v2727_v48 = vpop.permute.xlu1 %2301 }
 0x243   : > { %2331 = vrot.lane.b32.xlu0 %v2484_v0, %s2488_s27 }
 0x244   : > { %v2731_v50 = vpop.permute.xlu1 %2311 }
 0x247   : > { %2336 = vrot.lane.b32.xlu0 %v2484_v0, %s2487_s26 }
 0x248   : > { %v2735_v54 = vpop.permute.xlu1 %2321 }
 0x24b   : > { %2341 = vrot.lane.b32.xlu0 %v2484_v0, %s2487_s26 }
 0x24c   : > { %v2739_v56 = vpop.permute.xlu1 %2326 }
 0x2a6   : > { %v628_v57 = vpop.xlane.xlu1 %627 }
 0x2a7   : > { %v636_v58 = vmul.f32 0.00390625, %v628_v57 }
 0x2a9   : > { %v640_v60 = vadd.f32 1e-05, %v636_v58 }
 0x2ab   : > { %2379 = vrsqrt.f32 %v640_v60 }
 0x2ae   : > { %v634_v62 = vpop.xlane.xlu1 %633 }
 0x2af   : > { %v638_v63 = vmul.f32 0.00390625, %v634_v62 }
 0x2b1   : > { %v642_v1 = vadd.f32 1e-05, %v638_v63 }
 0x2b2   : > { %v625_v2 = vpop.xlane.xlu0 %624 }
 0x2b3   : > { %2381 = vrsqrt.f32 %v642_v1  ;;  %v635_v3 = vmul.f32 0.00390625, %v625_v2 }
 0x2b5   : > { %v639_v4 = vadd.f32 1e-05, %v635_v3 }
 0x2b6   : > { %v631_v5 = vpop.xlane.xlu0 %630 }
 0x2b7   : > { %2383 = vrsqrt.f32 %v639_v4  ;;  %v637_v6 = vmul.f32 0.00390625, %v631_v5 }
 0x2b8   : > { %v2380_v7 = vpop.eup %2379 }
 0x2b9   : > { %v649_v8 = vmul.f32 %v2380_v7, %v2681_v12  ;;  %v650_v9 = vmul.f32 %v2380_v7, %v2683_v13  ;;  %v641_v10 = vadd.f32 1e-05, %v637_v6 }
 0x2bb   : > { %v677_v11 = vmul.f32 %v663_v40, %v649_v8  ;;  %v678_v14 = vmul.f32 %v663_v40, %v650_v9  ;;  %2385 = vrsqrt.f32 %v641_v10  ;;  %v2888_v10 = vpop.permute.xlu0 %2331 }
 0x2bd   : > { %v701_v15 = vadd.f32 %v689_v43, %v677_v11  ;;  %v702_v16 = vadd.f32 %v689_v43, %v678_v14 }
 0x2bf   : > { %vm709_vm14 = vcmp.ge.f32.partialorder %v701_v15, 0.0  ;;  %vm710_vm15 = vcmp.ge.f32.partialorder %v702_v16, 0.0  ;;  %v717_v17 = vmul.f32 0.01, %v701_v15  ;;  %v718_v18 = vmul.f32 0.01, %v702_v16  ;;  %v2894_v11 = vpop.permute.xlu0 %2336 }
 0x2c0   : > { %v2382_v19 = vpop.eup %2381 }
 0x2c1   : > { %v2747_v20 = vsel %vm709_vm14, %v701_v15, %v717_v17  ;;  %v2749_v23 = vsel %vm710_vm15, %v702_v16, %v718_v18  ;;  %v653_v24 = vmul.f32 %v2382_v19, %v2689_v21  ;;  %v654_v12 = vmul.f32 %v2382_v19, %v2691_v22 }
 0x2c2   : > { %733 = vst [vmem:[#allocation2 + $0x40] sm:$0xff] %v2747_v20  ;;  %734 = vst [vmem:[#allocation2 + $0x78] sm:$0xff] %v2749_v23  ;;  %v2294_v15 = vunpack.i.h.bf16 %v2725_v45 }
 0x2c3   : > { %v681_v13 = vmul.f32 %v673_v38, %v653_v24  ;;  %v682_v25 = vmul.f32 %v673_v38, %v654_v12  ;;  %v2904_v14 = vpop.permute.xlu0 %2341  ;;  %v2304_v24 = vunpack.i.h.bf16 %v2727_v48 }
 0x2c4   : > { %v2384_v26 = vpop.eup %2383 }
 0x2c5   : > { %v705_v31 = vadd.f32 %v697_v39, %v681_v13  ;;  %v706_v32 = vadd.f32 %v697_v39, %v682_v25  ;;  %v647_v33 = vmul.f32 %v2384_v26, %v2702_v29  ;;  %v648_v34 = vmul.f32 %v2384_v26, %v2705_v30 }
 0x2c7   : > { %vm713_vm8 = vcmp.ge.f32.partialorder %v705_v31, 0.0  ;;  %vm714_vm13 = vcmp.ge.f32.partialorder %v706_v32, 0.0  ;;  %v721_v35 = vmul.f32 0.01, %v705_v31  ;;  %v722_v36 = vmul.f32 0.01, %v706_v32 }
 0x2c8   : > { %v2386_v21 = vpop.eup %2385  ;;  %v675_v37 = vmul.f32 %v658_v42, %v647_v33  ;;  %v676_v22 = vmul.f32 %v658_v42, %v648_v34 }
 0x2c9   : > { %v2757_v40 = vsel %vm713_vm8, %v705_v31, %v721_v35  ;;  %v2759_v43 = vsel %vm714_vm13, %v706_v32, %v722_v36  ;;  %v651_v38 = vmul.f32 %v2386_v21, %v2697_v27  ;;  %v652_v57 = vmul.f32 %v2386_v21, %v2699_v28  ;;  %v2763_v39 = vld [vmem:[#allocation2 + $0x78] sm:$0xff]  ;;  %v2765_v29 = vld [vmem:[#allocation2 + $0x40] sm:$0xff] }
 0x2ca   : > { %3476 = vst [vmem:[#allocation4_spill] sm:$0xff] %v2763_v39  ;;  %3477 = vst [vmem:[#allocation5_spill] sm:$0xff] %v2765_v29  ;;  %v699_v30 = vadd.f32 %v2723_v44, %v675_v37  ;;  %v700_v42 = vadd.f32 %v2723_v44, %v676_v22  ;;  %v2314_v31 = vunpack.i.h.bf16 %v2731_v50  ;;  %v2324_v36 = vunpack.i.h.bf16 %v2735_v54 }
 0x2cb   : > { %737 = vst [vmem:[#allocation2 + $0x70] sm:$0xff] %v2757_v40  ;;  %738 = vst [vmem:[#allocation2 + $0x38] sm:$0xff] %v2759_v43  ;;  %v679_v58 = vmul.f32 %v2729_v49, %v651_v38  ;;  %v680_v60 = vmul.f32 %v2729_v49, %v652_v57  ;;  %v2334_v57 = vunpack.i.h.bf16 %v2888_v10 }
 0x2cc   : > { %vm707_vm14 = vcmp.ge.f32.partialorder %v699_v30, 0.0  ;;  %vm708_vm15 = vcmp.ge.f32.partialorder %v700_v42, 0.0  ;;  %v715_v27 = vmul.f32 0.01, %v699_v30  ;;  %v716_v28 = vmul.f32 0.01, %v700_v42 }
 0x2cd   : > { %v703_v62 = vadd.f32 %v2721_v41, %v679_v58  ;;  %v704_v63 = vadd.f32 %v2721_v41, %v680_v60 }
 0x2ce   : > { %v2775_v1 = vsel %vm707_vm14, %v699_v30, %v715_v27  ;;  %v2777_v2 = vsel %vm708_vm15, %v700_v42, %v716_v28  ;;  %v2293_v27 = vunpack.i.l.bf16 %v2725_v45 }
 0x2cf   : > { %731 = vst [vmem:[#allocation2 + $0x8] sm:$0xff] %v2775_v1  ;;  %732 = vst [vmem:[#allocation2 + $0x18] sm:$0xff] %v2777_v2  ;;  %vm711_vm8 = vcmp.ge.f32.partialorder %v703_v62, 0.0  ;;  %vm712_vm13 = vcmp.ge.f32.partialorder %v704_v63, 0.0  ;;  %v719_v44 = vmul.f32 0.01, %v703_v62  ;;  %999 = vrot.lane.b32.xlu1 %v2777_v2, %s2489_s28  ;;  %997 = vrot.lane.b32.xlu0 %v2775_v1, %s2489_s28 }
 0x2d0   : > { %v720_v49 = vmul.f32 0.01, %v704_v63 }
 0x2d1   : > { %v727_v3 = vsel %vm711_vm8, %v703_v62, %v719_v44  ;;  %v2303_v44 = vunpack.i.l.bf16 %v2727_v48 }
 0x2d2   : > { %v2785_v41 = vsel %vm712_vm13, %v704_v63, %v720_v49  ;;  %v2787_v4 = vld [vmem:[#allocation2 + $0x38] sm:$0xff]  ;;  %v2789_v5 = vld [vmem:[#allocation2 + $0x70] sm:$0xff]  ;;  %735 = vst [vmem:[#allocation2 + $0x48] sm:$0xff] %v727_v3 }
 0x2d3   : > { %736 = vst [vmem:[#allocation2 + $0x68] sm:$0xff] %v2785_v41  ;;  %919 = vrot.lane.b32.xlu1 %v2777_v2, %s2490_s29  ;;  %917 = vrot.lane.b32.xlu0 %v2775_v1, %s2490_s29 }
 0x2d6   : > { %v2796_v6 = vld [vmem:[#allocation2 + $0x18] sm:$0xff]  ;;  %v2798_v7 = vld [vmem:[#allocation2 + $0x8] sm:$0xff] }
 0x2d7   : > { %3478 = vst [vmem:[#allocation6_spill] sm:$0xff] %v2796_v6  ;;  %3479 = vst [vmem:[#allocation7_spill] sm:$0xff] %v2798_v7  ;;  %847 = vrot.lane.b32.xlu1 %v2777_v2, %s2492_s6  ;;  %845 = vrot.lane.b32.xlu0 %v2775_v1, %s2492_s6 }
 0x2d9   : > { %v2806_v9 = vld [vmem:[#allocation2 + $0x48] sm:$0xff] }
 0x2da   : > { %v2804_v8 = vld [vmem:[#allocation2 + $0x68] sm:$0xff] }
 0x2db   : > { %767 = vrot.lane.b32.xlu1 %v2777_v2, %s2491_s30  ;;  %765 = vrot.lane.b32.xlu0 %v2775_v1, %s2491_s30 }
 0x2df   : > { %1251 = vrot.lane.b32.xlu1 %v2775_v1, %s2488_s27  ;;  %1253 = vrot.lane.b32.xlu0 %v2777_v2, %s2488_s27 }
 0x2e3   : > { %1003 = vrot.lane.b32.xlu1 %v2747_v20, %s2489_s28  ;;  %1005 = vrot.lane.b32.xlu0 %v2749_v23, %s2489_s28 }
 0x2e7   : > { %923 = vrot.lane.b32.xlu1 %v2747_v20, %s2490_s29  ;;  %925 = vrot.lane.b32.xlu0 %v2749_v23, %s2490_s29 }
 0x2eb   : > { %851 = vrot.lane.b32.xlu1 %v2747_v20, %s2492_s6  ;;  %853 = vrot.lane.b32.xlu0 %v2749_v23, %s2492_s6 }
 0x2ef   : > { %771 = vrot.lane.b32.xlu1 %v2747_v20, %s2491_s30  ;;  %773 = vrot.lane.b32.xlu0 %v2749_v23, %s2491_s30 }
 0x2f3   : > { %1259 = vrot.lane.b32.xlu1 %v2749_v23, %s2488_s27  ;;  %1011 = vrot.lane.b32.xlu0 %v2785_v41, %s2489_s28 }
 0x2f7   : > { %1257 = vrot.lane.b32.xlu1 %v2747_v20, %s2488_s27  ;;  %931 = vrot.lane.b32.xlu0 %v2785_v41, %s2490_s29 }
 0x2fb   : > { %1179 = vrot.lane.b32.xlu1 %v2749_v23, %s2487_s26  ;;  %859 = vrot.lane.b32.xlu0 %v2785_v41, %s2492_s6 }
 0x2ff   : > { %779 = vrot.lane.b32.xlu0 %v2785_v41, %s2491_s30  ;;  %1009 = vrot.lane.b32.xlu1 %v727_v3, %s2489_s28 }
 0x303   : > { %1263 = vrot.lane.b32.xlu0 %v727_v3, %s2488_s27  ;;  %929 = vrot.lane.b32.xlu1 %v727_v3, %s2490_s29 }
 0x307   : > { %1183 = vrot.lane.b32.xlu0 %v727_v3, %s2487_s26  ;;  %857 = vrot.lane.b32.xlu1 %v727_v3, %s2492_s6 }
 0x30b   : > { %1173 = vrot.lane.b32.xlu0 %v2777_v2, %s2487_s26  ;;  %777 = vrot.lane.b32.xlu1 %v727_v3, %s2491_s30 }
 0x30f   : > { %935 = vrot.lane.b32.xlu0 %v2757_v40, %s2490_s29  ;;  %1265 = vrot.lane.b32.xlu1 %v2785_v41, %s2488_s27 }
 0x313   : > { %863 = vrot.lane.b32.xlu0 %v2757_v40, %s2492_s6  ;;  %1185 = vrot.lane.b32.xlu1 %v2785_v41, %s2487_s26 }
 0x317   : > { %783 = vrot.lane.b32.xlu0 %v2757_v40, %s2491_s30  ;;  %1015 = vrot.lane.b32.xlu1 %v2757_v40, %s2489_s28 }
 0x31b   : > { %1103 = vrot.lane.b32.xlu0 %v727_v3, %s2486_s25  ;;  %1017 = vrot.lane.b32.xlu1 %v2759_v43, %s2489_s28 }
 0x31f   : > { %2351 = vrot.lane.b32.xlu0 %v2484_v0, %s2486_s25  ;;  %1177 = vrot.lane.b32.xlu1 %v2747_v20, %s2487_s26 }
 0x323   : > { %1093 = vrot.lane.b32.xlu0 %v2777_v2, %s2486_s25  ;;  %937 = vrot.lane.b32.xlu1 %v2759_v43, %s2490_s29 }
 0x327   : > { %1271 = vrot.lane.b32.xlu0 %v2759_v43, %s2488_s27  ;;  %1171 = vrot.lane.b32.xlu1 %v2775_v1, %s2487_s26 }
 0x32b   : > { %1269 = vrot.lane.b32.xlu0 %v2757_v40, %s2488_s27  ;;  %865 = vrot.lane.b32.xlu1 %v2759_v43, %s2492_s6 }
 0x32f   : > { %1335 = vrot.lane.b32.xlu0 %v727_v3, %s2485_s24  ;;  %2346 = vrot.lane.b32.xlu1 %v2484_v0, %s2486_s25 }
 0x333   : > { %1189 = vrot.lane.b32.xlu0 %v2757_v40, %s2487_s26  ;;  %785 = vrot.lane.b32.xlu1 %v2759_v43, %s2491_s30 }
 0x337   : > { %1111 = vrot.lane.b32.xlu0 %v2759_v43, %s2486_s25  ;;  %1105 = vrot.lane.b32.xlu1 %v2785_v41, %s2486_s25 }
 0x33b   : > { %1109 = vrot.lane.b32.xlu0 %v2757_v40, %s2486_s25  ;;  %1099 = vrot.lane.b32.xlu1 %v2749_v23, %s2486_s25 }
 0x33f   : > { %1343 = vrot.lane.b32.xlu0 %v2759_v43, %s2485_s24  ;;  %1097 = vrot.lane.b32.xlu1 %v2747_v20, %s2486_s25 }
 0x341   : > { %v1000_v16 = vpop.permute.xlu1 %999  ;;  %v998_v17 = vpop.permute.xlu0 %997 }
 0x342   : > { %v2912_v18 = vsel %vm358_vm9, %v2294_v15, %v998_v17  ;;  %v2915_v19 = vsel %vm358_vm9, %v998_v17, %v1000_v16 }
 0x343   : > { %1341 = vrot.lane.b32.xlu0 %v2757_v40, %s2485_s24  ;;  %1191 = vrot.lane.b32.xlu1 %v2759_v43, %s2487_s26  ;;  %v1380_v43 = vld [vmem:[%s3464_s2 + $0x8] sm:$0xff] }
 0x344   : > { %1540 = vmatprep.mubr.f32.mxu1 %v1380_v43 }
 0x345   : > { %v920_v12 = vpop.permute.xlu1 %919  ;;  %v918_v13 = vpop.permute.xlu0 %917 }
 0x346   : > { %v2923_v25 = vsel %vm337_vm10, %v2304_v24, %v918_v13  ;;  %v2926_v26 = vsel %vm337_vm10, %v918_v13, %v920_v12 }
 0x347   : > { %2361 = vrot.lane.b32.xlu0 %v2484_v0, %s2485_s24  ;;  %1091 = vrot.lane.b32.xlu1 %v2775_v1, %s2486_s25 }
 0x349   : > { %v848_v32 = vpop.permute.xlu1 %847  ;;  %v846_v33 = vpop.permute.xlu0 %845 }
 0x34a   : > { %v2934_v34 = vsel %vm314_vm12, %v2314_v31, %v846_v33  ;;  %v2937_v35 = vsel %vm314_vm12, %v846_v33, %v848_v32  ;;  %v2333_v32 = vunpack.i.l.bf16 %v2888_v10  ;;  %v2289_v10 = vunpack.i.h.bf16 %v2733_v51 }
 0x34b   : > { %883 = vst [vmem:[#allocation3 + $0x28] sm:$0xff] %v2934_v34  ;;  %884 = vst [vmem:[#allocation3 + $0x90] sm:$0xff] %v2937_v35  ;;  %1325 = vrot.lane.b32.xlu0 %v2777_v2, %s2485_s24  ;;  %2356 = vrot.lane.b32.xlu1 %v2484_v0, %s2485_s24 }
 0x34d   : > { %v768_v21 = vpop.permute.xlu1 %767  ;;  %v766_v37 = vpop.permute.xlu0 %765 }
 0x34e   : > { %v2947_v22 = vsel %vm290_vm11, %v2324_v36, %v766_v37  ;;  %v2950_v40 = vsel %vm290_vm11, %v766_v37, %v768_v21 }
 0x34f   : > { %v803_v38 = vsel %vm2583_vm5, %v2947_v22, 0.0  ;;  %v804_v0 = vsel %vm2587_vm6, %v2950_v40, 0.0  ;;  %1337 = vrot.lane.b32.xlu1 %v2785_v41, %s2485_s24 }
 0x350   : > { %811 = vst [vmem:[#allocation3 + $0x100] sm:$0xff] %v803_v38  ;;  %812 = vst [vmem:[#allocation3 + $0x110] sm:$0xff] %v804_v0  ;;  %v2343_v38 = vunpack.i.l.bf16 %v2904_v14 }
 0x351   : > { %v1252_v30 = vpop.permute.xlu1 %1251  ;;  %v1254_v42 = vpop.permute.xlu0 %1253 }
 0x352   : > { %v2965_v58 = vsel %vm440_vm7, %v1252_v30, %v1254_v42  ;;  %v2968_v60 = vsel %vm440_vm7, %v1254_v42, %v2334_v57 }
 0x353   : > { %1331 = vrot.lane.b32.xlu1 %v2749_v23, %s2485_s24  ;;  %v2313_v23 = vunpack.i.l.bf16 %v2731_v50 }
 0x355   : > { %v1004_v28 = vpop.permute.xlu1 %1003  ;;  %v1006_v62 = vpop.permute.xlu0 %1005 }
 0x356   : > { %v2974_v63 = vsel %vm358_vm9, %v2293_v27, %v1004_v28  ;;  %v2977_v2 = vsel %vm358_vm9, %v1004_v28, %v1006_v62 }
 0x357   : > { %1329 = vrot.lane.b32.xlu1 %v2747_v20, %s2485_s24  ;;  %v2323_v20 = vunpack.i.l.bf16 %v2735_v54 }
 0x359   : > { %v924_v49 = vpop.permute.xlu1 %923  ;;  %v926_v3 = vpop.permute.xlu0 %925 }
 0x35a   : > { %v2983_v41 = vsel %vm337_vm10, %v2303_v44, %v924_v49  ;;  %v2986_v45 = vsel %vm337_vm10, %v924_v49, %v926_v3  ;;  %v2299_v44 = vunpack.i.h.bf16 %v2737_v55 }
 0x35b   : > { %1323 = vrot.lane.b32.xlu1 %v2775_v1, %s2485_s24 }
 0x35d   : > { %v852_v15 = vpop.permute.xlu1 %851  ;;  %v854_v16 = vpop.permute.xlu0 %853 }
 0x35e   : > { %v2992_v17 = vsel %vm314_vm12, %v2313_v23, %v852_v15  ;;  %v2995_v48 = vsel %vm314_vm12, %v852_v15, %v854_v16  ;;  %v2309_v16 = vunpack.i.h.bf16 %v2741_v59 }
 0x361   : > { %v772_v24 = vpop.permute.xlu1 %771  ;;  %v774_v12 = vpop.permute.xlu0 %773 }
 0x362   : > { %v2999_v13 = vsel %vm290_vm11, %v2323_v20, %v772_v24  ;;  %v3002_v31 = vsel %vm290_vm11, %v772_v24, %v774_v12 }
 0x363   : > { %v805_v50 = vsel %vm2583_vm5, %v2999_v13, 0.0  ;;  %v806_v1 = vsel %vm2587_vm6, %v3002_v31, 0.0 }
 0x364   : > { %813 = vst [vmem:[#allocation3 + $0xc0] sm:$0xff] %v805_v50  ;;  %814 = vst [vmem:[#allocation3 + $0x1d8] sm:$0xff] %v806_v1  ;;  %v2319_v1 = vunpack.i.h.bf16 %v2743_v61 }
 0x365   : > { %v1260_v54 = vpop.permute.xlu1 %1259  ;;  %v1012_v33 = vpop.permute.xlu0 %1011 }
 0x366   : > { %v3012_v36 = vsel %vm440_vm7, %v1260_v54, %v2333_v32  ;;  %v2344_v32 = vunpack.i.h.bf16 %v2904_v14  ;;  %v2298_v14 = vunpack.i.l.bf16 %v2737_v55 }
 0x369   : > { %v1258_v21 = vpop.permute.xlu1 %1257  ;;  %v932_v37 = vpop.permute.xlu0 %931 }
 0x36a   : > { %v3015_v43 = vsel %vm440_vm7, %v1258_v21, %v1260_v54 }
 0x36d   : > { %v1180_v0 = vpop.permute.xlu1 %1179  ;;  %v860_v57 = vpop.permute.xlu0 %859 }
 0x36e   : > { %v3019_v30 = vsel %vm416_vm4, %v1180_v0, %v2343_v38 }
 0x371   : > { %v1010_v42 = vpop.permute.xlu1 %1009  ;;  %v780_v27 = vpop.permute.xlu0 %779 }
 0x372   : > { %v1023_v28 = vsel %vm358_vm9, %v2289_v10, %v1010_v42  ;;  %v1024_v62 = vsel %vm358_vm9, %v1010_v42, %v1012_v33  ;;  %v2329_v42 = vunpack.i.h.bf16 %v2739_v56 }
 0x375   : > { %v930_v49 = vpop.permute.xlu1 %929  ;;  %v1264_v3 = vpop.permute.xlu0 %1263 }
 0x376   : > { %v3026_v23 = vsel %vm337_vm10, %v2299_v44, %v930_v49  ;;  %v3029_v15 = vsel %vm337_vm10, %v930_v49, %v932_v37 }
 0x379   : > { %v858_v20 = vpop.permute.xlu1 %857  ;;  %v1184_v24 = vpop.permute.xlu0 %1183 }
 0x37a   : > { %v3033_v12 = vsel %vm314_vm12, %v2309_v16, %v858_v20  ;;  %v3036_v50 = vsel %vm314_vm12, %v858_v20, %v860_v57 }
 0x37d   : > { %v778_v54 = vpop.permute.xlu1 %777  ;;  %v1174_v33 = vpop.permute.xlu0 %1173 }
 0x37e   : > { %v3041_v21 = vsel %vm290_vm11, %v2319_v1, %v778_v54  ;;  %v3044_v37 = vsel %vm290_vm11, %v778_v54, %v780_v27  ;;  %v3047_v38 = vsel %vm416_vm4, %v1174_v33, %v2344_v32  ;;  %v2308_v1 = vunpack.i.l.bf16 %v2741_v59 }
 0x37f   : > { %v807_v57 = vsel %vm2583_vm5, %v3041_v21, 0.0  ;;  %v808_v10 = vsel %vm2587_vm6, %v3044_v37, 0.0  ;;  %v2339_v32 = vunpack.i.h.bf16 %v2894_v11 }
 0x380   : > { %815 = vst [vmem:[#allocation3 + $0x78] sm:$0xff] %v807_v57  ;;  %816 = vst [vmem:[#allocation3 + $0xf8] sm:$0xff] %v808_v10  ;;  %v2288_v10 = vunpack.i.l.bf16 %v2733_v51 }
 0x381   : > { %v1266_v44 = vpop.permute.xlu1 %1265  ;;  %v936_v27 = vpop.permute.xlu0 %935 }
 0x382   : > { %v3058_v49 = vsel %vm440_vm7, %v1264_v3, %v1266_v44  ;;  %v3061_v16 = vsel %vm440_vm7, %v1266_v44, %v2329_v42  ;;  %v945_v20 = vsel %vm337_vm10, %v2298_v14, %v936_v27  ;;  %v2318_v42 = vunpack.i.l.bf16 %v2743_v61 }
 0x385   : > { %v1186_v54 = vpop.permute.xlu1 %1185  ;;  %v864_v55 = vpop.permute.xlu0 %863 }
 0x386   : > { %v3067_v7 = vsel %vm416_vm4, %v1184_v24, %v1186_v54  ;;  %v3070_v57 = vsel %vm416_vm4, %v1186_v54, %v2339_v32  ;;  %v873_v3 = vsel %vm314_vm12, %v2308_v1, %v864_v55 }
 0x389   : > { %v1016_v44 = vpop.permute.xlu1 %1015  ;;  %v784_v14 = vpop.permute.xlu0 %783 }
 0x38a   : > { %v1025_v59 = vsel %vm358_vm9, %v2288_v10, %v1016_v44  ;;  %v793_v6 = vsel %vm290_vm11, %v2318_v42, %v784_v14 }
 0x38b   : > { %v809_v29 = vsel %vm2583_vm5, %v793_v6, 0.0 }
 0x38c   : > { %817 = vst [vmem:[#allocation3 + $0x1b8] sm:$0xff] %v809_v29 }
 0x38d   : > { %v1018_v24 = vpop.permute.xlu1 %1017  ;;  %v1104_v39 = vpop.permute.xlu0 %1103 }
 0x38e   : > { %v1026_v32 = vsel %vm358_vm9, %v1016_v44, %v1018_v24 }
 0x38f   : > { %2428 = vmatprep.subr.msk.mxu1 %vm2587_vm6, %v1026_v32 }
 0x390   : > { %2429 = vmatpush1.msk.msra.mxu1 %vm2583_vm5, %v1025_v59 }
 0x391   : > { %v1178_v51 = vpop.permute.xlu1 %1177  ;;  %v3082_v1 = vpop.permute.xlu0 %2351  ;;  %2430 = vmatprep.subr.msk.mxu1 %vm2587_vm6, %v1024_v62 }
 0x392   : > { %v3087_v61 = vsel %vm416_vm4, %v1178_v51, %v1180_v0  ;;  %v2354_v54 = vunpack.i.h.bf16 %v3082_v1  ;;  %2431 = vmatpush1.msk.msra.mxu1 %vm2583_vm5, %v1023_v28 }
 0x393   : > { %2432 = vmatprep.subr.msk.mxu1 %vm2587_vm6, %v2977_v2  ;;  %v2328_v2 = vunpack.i.l.bf16 %v2739_v56 }
 0x394   : > { %2433 = vmatpush1.msk.msra.mxu1 %vm2583_vm5, %v2974_v63 }
 0x395   : > { %v938_v29 = vpop.permute.xlu1 %937  ;;  %v3097_v10 = vpop.permute.xlu0 %1093  ;;  %2434 = vmatprep.subr.msk.mxu1 %vm2587_vm6, %v2915_v19 }
 0x396   : > { %v946_v0 = vsel %vm337_vm10, %v936_v27, %v938_v29  ;;  %v3105_v42 = vsel %vm389_vm0, %v3097_v10, %v2354_v54  ;;  %2435 = vmatpush1.msk.msra.mxu1 %vm2583_vm5, %v2912_v18  ;;  %v3480_v29 = vld [vmem:[#allocation4_spill] sm:$0xff] }
 0x397   : > { %2436 = vmatprep.subr.msk.mxu1 %vm2577_vm2, %v946_v0  ;;  %v3481_v0 = vld [vmem:[#allocation5_spill] sm:$0xff] }
 0x398   : > { %2437 = vmatpush1.msk.msra.mxu1 %vm2573_vm1, %v945_v20 }
 0x399   : > { %v1172_v63 = vpop.permute.xlu1 %1171  ;;  %v1272_v28 = vpop.permute.xlu0 %1271  ;;  %2438 = vmatprep.subr.msk.mxu1 %vm2577_vm2, %v3029_v15 }
 0x39a   : > { %v3119_v62 = vsel %vm416_vm4, %v1172_v63, %v1174_v33  ;;  %v1282_v27 = vsel %vm440_vm7, %v1272_v28, %v2328_v2  ;;  %2439 = vmatpush1.msk.msra.mxu1 %vm2573_vm1, %v3026_v23  ;;  %v3483_v2 = vld [vmem:[#allocation7_spill] sm:$0xff]  ;;  %v3278_v63 = vld [vmem:[#allocation2 + $0x28] sm:$0xff] }
 0x39b   : > { %2440 = vmatprep.subr.msk.mxu1 %vm2577_vm2, %v2986_v45 }
 0x39c   : > { %2441 = vmatpush1.msk.msra.mxu1 %vm2573_vm1, %v2983_v41 }
 0x39d   : > { %v866_v56 = vpop.permute.xlu1 %865  ;;  %v1270_v18 = vpop.permute.xlu0 %1269  ;;  %2442 = vmatprep.subr.msk.mxu1 %vm2577_vm2, %v2926_v26 }
 0x39e   : > { %v874_v19 = vsel %vm314_vm12, %v864_v55, %v866_v56  ;;  %v1281_v33 = vsel %vm440_vm7, %v1270_v18, %v1272_v28  ;;  %2443 = vmatpush1.msk.msra.mxu1 %vm2573_vm1, %v2923_v25  ;;  %v1384_v28 = vld [vmem:[%s3464_s2 + $0x28] sm:$0xff]  ;;  %v1389_v56 = vld [vmem:[%s3464_s2 + $0x50] sm:$0xff] }
 0x39f   : > { %1492 = vmatprep.subr.mxu1 %v874_v19  ;;  %v1388_v18 = vld [vmem:[%s3464_s2 + $0x48] sm:$0xff]  ;;  %v1390_v19 = vld [vmem:[%s3464_s2 + $0x58] sm:$0xff] }
 0x3a0   : > { %1493 = vmatpush1.msra.mxu1 %v873_v3 }
 0x3a1   : > { %v2347_v45 = vpop.permute.xlu1 %2346  ;;  %v3142_v23 = vpop.permute.xlu0 %1335  ;;  %1494 = vmatprep.subr.mxu1 %v3036_v50 }
 0x3a2   : > { %1495 = vmatpush1.msra.mxu1 %v3033_v12  ;;  %v2349_v20 = vunpack.i.h.bf16 %v2347_v45  ;;  %v2348_v55 = vunpack.i.l.bf16 %v2347_v45 }
 0x3a3   : > { %1496 = vmatprep.subr.mxu1 %v2995_v48 }
 0x3a4   : > { %1497 = vmatpush1.msra.mxu1 %v2992_v17 }
 0x3a5   : > { %v786_v41 = vpop.permute.xlu1 %785  ;;  %v1190_v15 = vpop.permute.xlu0 %1189  ;;  %1498 = vmatprep.subr.mxu1 %v2937_v35 }
 0x3a6   : > { %v794_v26 = vsel %vm290_vm11, %v784_v14, %v786_v41  ;;  %1499 = vmatpush1.msra.mxu1 %v2934_v34  ;;  %v2353_v34 = vunpack.i.l.bf16 %v3082_v1 }
 0x3a7   : > { %v810_v25 = vsel %vm2587_vm6, %v794_v26, 0.0  ;;  %2444 = vmatprep.subr.msk.mxu1 %vm2587_vm6, %v794_v26 }
 0x3a8   : > { %818 = vst [vmem:[#allocation3 + $0x38] sm:$0xff] %v810_v25  ;;  %2445 = vmatpush1.msk.msra.mxu1 %vm2583_vm5, %v793_v6 }
 0x3a9   : > { %v1106_v48 = vpop.permute.xlu1 %1105  ;;  %v1112_v12 = vpop.permute.xlu0 %1111  ;;  %2446 = vmatprep.subr.msk.mxu1 %vm2587_vm6, %v3044_v37 }
 0x3aa   : > { %v1119_v17 = vsel %vm389_vm0, %v1104_v39, %v1106_v48  ;;  %v1120_v35 = vsel %vm389_vm0, %v1106_v48, %v2349_v20  ;;  %v1122_v50 = vsel %vm389_vm0, %v1112_v12, %v2348_v55  ;;  %2447 = vmatpush1.msk.msra.mxu1 %vm2583_vm5, %v3041_v21 }
 0x3ab   : > { %2448 = vmatprep.subr.msk.mxu1 %vm2587_vm6, %v3002_v31 }
 0x3ac   : > { %2449 = vmatpush1.msk.msra.mxu1 %vm2583_vm5, %v2999_v13  ;;  %v2338_v13 = vunpack.i.l.bf16 %v2894_v11 }
 0x3ad   : > { %v1100_v6 = vpop.permute.xlu1 %1099  ;;  %v1110_v39 = vpop.permute.xlu0 %1109  ;;  %2450 = vmatprep.subr.msk.mxu1 %vm2587_vm6, %v2950_v40 }
 0x3ae   : > { %v1118_v3 = vsel %vm389_vm0, %v1100_v6, %v2353_v34  ;;  %v1121_v37 = vsel %vm389_vm0, %v1110_v39, %v1112_v12  ;;  %2451 = vmatpush1.msk.msra.mxu1 %vm2583_vm5, %v2947_v22 }
 0x3af   : > { %1508 = vmatprep.subr.mxu1 %v1282_v27  ;;  %v1387_v27 = vld [vmem:[%s3464_s2 + $0x40] sm:$0xff] }
 0x3b0   : > { %1509 = vmatpush2.msra.mxu1 %v1281_v33  ;;  %v2495_v33 = vmov 2  }
 0x3b1   : > { %v1098_v31 = vpop.permute.xlu1 %1097  ;;  %v1344_v21 = vpop.permute.xlu0 %1343  ;;  %1510 = vmatprep.subr.mxu1 %v3061_v16  ;;  %2365 = vset.pattern.permute.xlu1 %v2495_v33 }
 0x3b2   : > { %v1117_v44 = vsel %vm389_vm0, %v1098_v31, %v1100_v6  ;;  %1511 = vmatpush2.msra.mxu1 %v3058_v49  ;;  %2366 = vset.pattern.permute.xlu0 %v2495_v33 }
 0x3b3   : > { %1512 = vmatprep.subr.mxu1 %v3012_v36 }
 0x3b4   : > { %1513 = vmatpush2.msra.mxu1 %v3015_v43 }
 0x3b5   : > { %v1192_v14 = vpop.permute.xlu1 %1191  ;;  %v1342_v40 = vpop.permute.xlu0 %1341  ;;  %1514 = vmatprep.subr.mxu1 %v2968_v60 }
 0x3b6   : > { %v1201_v22 = vsel %vm416_vm4, %v1190_v15, %v1192_v14  ;;  %v1202_v59 = vsel %vm416_vm4, %v1192_v14, %v2338_v13  ;;  %v1353_v24 = vsel %vm459_vm3, %v1342_v40, %v1344_v21  ;;  %1515 = vmatpush2.msra.mxu1 %v2965_v58 }
 0x3b7   : > { %2452 = vmatprep.subr.msk.mxu1 %vm2587_vm6, %v1202_v59 }
 0x3b8   : > { %2453 = vmatpush2.msk.msra.mxu1 %vm2583_vm5, %v1201_v22 }
 0x3b9   : > { %v1092_v11 = vpop.permute.xlu1 %1091  ;;  %v2362_v49 = vpop.permute.xlu0 %2361  ;;  %2454 = vmatprep.subr.msk.mxu1 %vm2587_vm6, %v3070_v57 }
 0x3ba   : > { %v1115_v36 = vsel %vm389_vm0, %v1092_v11, %v3097_v10  ;;  %v2364_v43 = vunpack.i.h.bf16 %v2362_v49  ;;  %2455 = vmatpush2.msk.msra.mxu1 %vm2583_vm5, %v3067_v7  ;;  %v2363_v51 = vunpack.i.l.bf16 %v2362_v49  ;;  %vm1463_vm0 = vcmask 261120   ;;  %v2424_v49 = vld [vmem:[%s3465_s3 + $0x18] sm:$0xff] }
 0x3bb   : > { %2456 = vmatprep.subr.msk.mxu1 %vm2587_vm6, %v3019_v30 }
 0x3bc   : > { %2457 = vmatpush2.msk.msra.mxu1 %vm2583_vm5, %v3087_v61 }
 0x3bd   : > { %v2357_v58 = vpop.permute.xlu1 %2356  ;;  %v1326_v60 = vpop.permute.xlu0 %1325  ;;  %2458 = vmatprep.subr.msk.mxu1 %vm2587_vm6, %v3047_v38 }
 0x3be   : > { %v2358_v16 = vunpack.i.l.bf16 %v2357_v58  ;;  %v1348_v32 = vsel %vm459_vm3, %v1326_v60, %v2364_v43  ;;  %2459 = vmatpush2.msk.msra.mxu1 %vm2583_vm5, %v3119_v62  ;;  %v2359_v7 = vunpack.i.h.bf16 %v2357_v58  ;;  %v1385_v62 = vld [vmem:[%s3464_s2 + $0x30] sm:$0xff] }
 0x3bf   : > { %2460 = vmatprep.subr.msk.mxu1 %vm2577_vm2, %v1122_v50 }
 0x3c0   : > { %v1354_v30 = vsel %vm459_vm3, %v1344_v21, %v2358_v16  ;;  %2461 = vmatpush2.msk.msra.mxu1 %vm2573_vm1, %v1121_v37 }
 0x3c1   : > { %v1338_v57 = vpop.permute.xlu1 %1337  ;;  %2462 = vmatprep.subr.msk.mxu1 %vm2577_vm2, %v1120_v35  ;;  %2463 = vmatprep.subr.msk.mxu0 %vm2577_vm2, %v1354_v30 }
 0x3c2   : > { %v1351_v1 = vsel %vm459_vm3, %v3142_v23, %v1338_v57  ;;  %v1352_v53 = vsel %vm459_vm3, %v1338_v57, %v2359_v7  ;;  %2464 = vmatpush2.msk.msra.mxu1 %vm2573_vm1, %v1119_v17  ;;  %2465 = vmatpush1.msk.msra.mxu0 %vm2573_vm1, %v1353_v24 }
 0x3c3   : > { %2466 = vmatprep.subr.msk.mxu1 %vm2577_vm2, %v1118_v3  ;;  %2467 = vmatprep.subr.msk.mxu0 %vm2577_vm2, %v1352_v53 }
 0x3c4   : > { %2468 = vmatpush2.msk.msra.mxu1 %vm2573_vm1, %v1117_v44  ;;  %2469 = vmatpush1.msk.msra.mxu0 %vm2573_vm1, %v1351_v1 }
 0x3c5   : > { %v1332_v52 = vpop.permute.xlu1 %1331  ;;  %2470 = vmatprep.subr.msk.mxu1 %vm2577_vm2, %v3105_v42  ;;  %v1383_v42 = vld [vmem:[%s3464_s2 + $0x20] sm:$0xff] }
 0x3c6   : > { %v1350_v38 = vsel %vm459_vm3, %v1332_v52, %v2363_v51  ;;  %2471 = vmatpush2.msk.msra.mxu1 %vm2573_vm1, %v1115_v36  ;;  %v2496_v36 = vmov 3  }
 0x3c7   : > { %1532 = vmatprep.subr.mxu1 %v2787_v4  ;;  %2472 = vmatprep.subr.msk.mxu0 %vm2577_vm2, %v1350_v38  ;;  %v1379_v4 = vld [vmem:[%s3464_s2] sm:$0xff] }
 0x3c8   : > { %1533 = vmatpush2.msra.mxu1 %v2789_v5 }
 0x3c9   : > { %v1330_v61 = vpop.permute.xlu1 %1329  ;;  %1534 = vmatprep.subr.mxu1 %v2804_v8  ;;  %v3482_v8 = vld [vmem:[#allocation6_spill] sm:$0xff] }
 0x3ca   : > { %v1349_v54 = vsel %vm459_vm3, %v1330_v61, %v1332_v52  ;;  %1535 = vmatpush2.msra.mxu1 %v2806_v9  ;;  %v1381_v9 = vld [vmem:[%s3464_s2 + $0x10] sm:$0xff] }
 0x3cb   : > { %1536 = vmatprep.subr.mxu1 %v3480_v29  ;;  %2473 = vmatpush1.msk.msra.mxu0 %vm2573_vm1, %v1349_v54  ;;  %v2425_v54 = vld [vmem:[%s3465_s3 + $0x10] sm:$0xff] }
 0x3cc   : > { %1537 = vmatpush2.msra.mxu1 %v3481_v0  ;;  %2474 = vmatprep.subr.msk.mxu0 %vm2577_vm2, %v1348_v32 }
 0x3cd   : > { %v1324_v10 = vpop.permute.xlu1 %1323  ;;  %1538 = vmatprep.subr.mxu1 %v3482_v8 }
 0x3ce   : > { %v1347_v5 = vsel %vm459_vm3, %v1324_v10, %v1326_v60  ;;  %1539 = vmatpush2.msra.mxu1 %v3483_v2 }
 0x3cf   : > { %1541 = vmatmul.mubr.f32.vlgmr.msra.gmra.mxu1 %v1379_v4  ;;  %2475 = vmatpush1.msk.msra.mxu0 %vm2573_vm1, %v1347_v5 }
 0x3d0   : > { %2230 = vmatmul.mubr.msk.f32.vlgmr.msra.gmra.mxu0 %vm1463_vm0, %v1381_v9  ;;  %1546 = vmatprep.mubr.f32.mxu1 %v1383_v42 }
 0x3d1   : > { %1635 = vmatprep.mubr.f32.mxu0 %v3278_v63 }
 0x3d3   : > { %1547 = vmatmul.mubr.f32.gmra.mxu1 %v1382_v47 }
 0x3d4   : > { %2231 = vmatmul.mubr.msk.f32.gmra.mxu0 %vm1463_vm0, %v1384_v28  ;;  %1552 = vmatprep.mubr.f32.mxu1 %v1386_v46 }
 0x3d5   : > { %1641 = vmatprep.mubr.f32.mxu0 %v3278_v63 }
 0x3d7   : > { %1553 = vmatmul.mubr.f32.gmra.mxu1 %v1385_v62 }
 0x3d8   : > { %2232 = vmatmul.mubr.msk.f32.gmra.mxu0 %vm1463_vm0, %v1387_v27  ;;  %1558 = vmatprep.mubr.f32.mxu1 %v1389_v56  ;;  %v3325_v56 = vld [vmem:[%s3465_s3 + $0x8] sm:$0xff] }
 0x3d9   : > { %1647 = vmatprep.mubr.f32.mxu0 %v3278_v63 }
 0x3db   : > { %1559 = vmatmul.mubr.f32.gmra.mxu1 %v1388_v18  ;;  %v3331_v18 = vld [vmem:[%s3465_s3] sm:$0xff] }
 0x3dc   : > { %2233 = vmatmul.mubr.msk.f32.gmra.mxu0 %vm1463_vm0, %v1390_v19 }
 0x3dd   : > { %2006 = vmatprep.mubr.f32.mxu0 %v3278_v63 }
 0x48f   : > { %v1542_v45 = vpop.f32.mrf.mxu1 }
 0x490   : > { %v1631_v23 = vpop.f32.mrf.mxu0 }
 0x491   : > { %v1544_v41 = vpop.f32.mrf.mxu1  ;;  %v1632_v24 = vadd.f32 %v1631_v23, %v1542_v45 }
 0x492   : > { %v1633_v15 = vpop.f32.mrf.mxu0 }
 0x493   : > { %v1548_v26 = vpop.f32.mrf.mxu1  ;;  %v1634_v22 = vadd.f32 %v1633_v15, %v1544_v41 }
 0x494   : > { %v1637_v25 = vpop.f32.mrf.mxu0 }
 0x495   : > { %v1550_v20 = vpop.f32.mrf.mxu1  ;;  %v1638_v40 = vadd.f32 %v1637_v25, %v1548_v26  ;;  %v1654_v11 = vadd.f32 %v1634_v22, %v1632_v24 }
 0x496   : > { %v1639_v55 = vpop.f32.mrf.mxu0 }
 0x497   : > { %v1554_v48 = vpop.f32.mrf.mxu1  ;;  %v1640_v13 = vadd.f32 %v1639_v55, %v1550_v20 }
 0x498   : > { %v1643_v12 = vpop.f32.mrf.mxu0 }
 0x499   : > { %v1556_v17 = vpop.f32.mrf.mxu1  ;;  %v1644_v50 = vadd.f32 %v1643_v12, %v1554_v48  ;;  %v1657_v59 = vadd.f32 %v1640_v13, %v1638_v40 }
 0x49a   : > { %v1645_v35 = vpop.f32.mrf.mxu0 }
 0x49b   : > { %v1646_v34 = vadd.f32 %v1645_v35, %v1556_v17  ;;  %v1560_v6 = vpop.f32.mrf.mxu1 }
 0x49c   : > { %v1649_v39 = vpop.f32.mrf.mxu0 }
 0x49d   : > { %v1660_v3 = vadd.f32 %v1646_v34, %v1644_v50  ;;  %v1562_v37 = vpop.f32.mrf.mxu1  ;;  %v1650_v21 = vadd.f32 %v1649_v39, %v1560_v6  ;;  %v2497_v6 = vmov 8  }
 0x49e   : > { %v1651_v31 = vpop.f32.mrf.mxu0 }
 0x49f   : > { %v1652_v44 = vadd.f32 %v1651_v31, %v1562_v37  ;;  %1661 = vadd.xlane.f32.xlu1 %v1660_v3 }
 0x4a1   : > { %v1663_v14 = vadd.f32 %v1652_v44, %v1650_v21 }
 0x4a3   : > { %1664 = vadd.xlane.f32.xlu0 %v1663_v14 }
 0x4a7   : > { %1658 = vadd.xlane.f32.xlu0 %v1657_v59 }
 0x4ab   : > { %1655 = vadd.xlane.f32.xlu0 %v1654_v11 }
 0x4b0   : > { %1731 = vperm.xlu1 %2365, %v2424_v49  }
 0x4b4   : > { %2367 = vset.pattern.permute.xlu1 %v2496_v36 }
 0x4b5   : > { %1755 = vperm.xlu1 %2367, %v2424_v49  }
 0x528   : > { %v1662_v43 = vpop.xlane.xlu1 %1661 }
 0x529   : > { %v1668_v58 = vmul.f32 0.00390625, %v1662_v43 }
 0x52b   : > { %v1674_v60 = vsub.f32 %v1644_v50, %v1668_v58  ;;  %v1675_v16 = vsub.f32 %v1646_v34, %v1668_v58 }
 0x52c   : > { %v1665_v32 = vpop.xlane.xlu0 %1664  ;;  %v1732_v23 = vpop.permute.xlu1 %1731 }
 0x52d   : > { %v1682_v7 = vmul.f32 %v1674_v60, %v1674_v60  ;;  %v1683_v30 = vmul.f32 %v1675_v16, %v1675_v16  ;;  %v1669_v57 = vmul.f32 0.00390625, %v1665_v32 }
 0x52f   : > { %v3311_v51 = vsub.f32 %v1650_v21, %v1669_v57  ;;  %v3313_v1 = vsub.f32 %v1652_v44, %v1669_v57  ;;  %v1692_v53 = vadd.f32 %v1683_v30, %v1682_v7 }
 0x530   : > { %v1659_v29 = vpop.xlane.xlu0 %1658  ;;  %v1756_v41 = vpop.permute.xlu1 %1755 }
 0x531   : > { %v1684_v52 = vmul.f32 %v3311_v51, %v3311_v51  ;;  %v1685_v38 = vmul.f32 %v3313_v1, %v3313_v1  ;;  %1693 = vadd.xlane.f32.xlu0 %v1692_v53  ;;  %v1667_v4 = vmul.f32 0.00390625, %v1659_v29 }
 0x533   : > { %v1695_v61 = vadd.f32 %v1685_v38, %v1684_v52  ;;  %v1672_v9 = vsub.f32 %v1638_v40, %v1667_v4  ;;  %v1673_v42 = vsub.f32 %v1640_v13, %v1667_v4 }
 0x534   : > { %v1656_v10 = vpop.xlane.xlu0 %1655 }
 0x535   : > { %1696 = vadd.xlane.f32.xlu1 %v1695_v61  ;;  %v1666_v0 = vmul.f32 0.00390625, %v1656_v10  ;;  %v1680_v28 = vmul.f32 %v1672_v9, %v1672_v9  ;;  %v1681_v46 = vmul.f32 %v1673_v42, %v1673_v42 }
 0x537   : > { %v1670_v5 = vsub.f32 %v1632_v24, %v1666_v0  ;;  %v1671_v8 = vsub.f32 %v1634_v22, %v1666_v0  ;;  %v1689_v27 = vadd.f32 %v1681_v46, %v1680_v28 }
 0x539   : > { %v1678_v2 = vmul.f32 %v1670_v5, %v1670_v5  ;;  %v1679_v47 = vmul.f32 %v1671_v8, %v1671_v8 }
 0x53b   : > { %v1686_v62 = vadd.f32 %v1679_v47, %v1678_v2  ;;  %v2500_v2 = vmov 7  }
 0x546   : > { %1751 = vperm.xlu1 %2367, %v2425_v54  }
 0x547   : > { %1727 = vperm.xlu0 %2366, %v2425_v54  }
 0x54a   : > { %2368 = vset.pattern.permute.xlu1 %v2495_v33 }
 0x566   : > { %1687 = vadd.xlane.f32.xlu0 %v1686_v62 }
 0x56a   : > { %1690 = vadd.xlane.f32.xlu1 %v1689_v27 }
 0x57b   : > { %1723 = vperm.xlu1 %2368, %v3325_v56  }
 0x57c   : > { %1719 = vperm.xlu0 %2366, %v3331_v18  }
 0x57f   : > { %2369 = vset.pattern.permute.xlu1 %v2496_v36 }
 0x580   : > { %1747 = vperm.xlu1 %2369, %v3325_v56   ;;  %2370 = vset.pattern.permute.xlu0 %v2497_v6 }
 0x584   : > { %1743 = vperm.xlu1 %2369, %v3331_v18  }
 0x588   : > { %2371 = vset.pattern.permute.xlu1 %v2497_v6 }
 0x5ba   : > { %v1694_v19 = vpop.xlane.xlu0 %1693 }
 0x5bb   : > { %v1700_v33 = vmul.f32 0.00390625, %v1694_v19 }
 0x5bd   : > { %v1704_v45 = vadd.f32 1e-05, %v1700_v33 }
 0x5be   : > { %v1697_v15 = vpop.xlane.xlu1 %1696 }
 0x5bf   : > { %2387 = vrsqrt.f32 %v1704_v45  ;;  %v1701_v39 = vmul.f32 0.00390625, %v1697_v15  ;;  %v3386_v45 = vld [vmem:[%s3466_s4 + $0x8] sm:$0xff] }
 0x5c1   : > { %v1705_v21 = vadd.f32 1e-05, %v1701_v39 }
 0x5c2   : > { %v1728_v55 = vpop.permute.xlu0 %1727  ;;  %v1752_v17 = vpop.permute.xlu1 %1751 }
 0x5cc   : > { %v2388_v26 = vpop.eup %2387 }
 0x5cd   : > { %v1714_v25 = vmul.f32 %v2388_v26, %v1674_v60  ;;  %v1715_v20 = vmul.f32 %v2388_v26, %v1675_v16 }
 0x5cf   : > { %v1738_v48 = vmul.f32 %v1728_v55, %v1714_v25  ;;  %v1739_v12 = vmul.f32 %v1728_v55, %v1715_v20 }
 0x5d1   : > { %v3336_v35 = vadd.f32 %v1752_v17, %v1738_v48  ;;  %v3338_v50 = vadd.f32 %v1752_v17, %v1739_v12 }
 0x5d3   : > { %v1810_v34 = vadd.f32 %v3338_v50, %v3336_v35 }
 0x5d5   : > { %1811 = vadd.xlane.f32.xlu0 %v1810_v34 }
 0x5eb   : > { %1778 = vrot.lane.b32.xlu0 %v3325_v56, %s2486_s25 }
 0x5ef   : > { %v1688_v3 = vpop.xlane.xlu0 %1687 }
 0x5f0   : > { %v1698_v37 = vmul.f32 0.00390625, %v1688_v3 }
 0x5f2   : > { %v1702_v31 = vadd.f32 1e-05, %v1698_v37 }
 0x5f3   : > { %v1691_v44 = vpop.xlane.xlu1 %1690 }
 0x5f4   : > { %2389 = vrsqrt.f32 %v1702_v31  ;;  %v1699_v13 = vmul.f32 0.00390625, %v1691_v44 }
 0x5f5   : > { %2391 = vrsqrt.f32 %v1705_v21 }
 0x5f6   : > { %v1703_v14 = vadd.f32 1e-05, %v1699_v13 }
 0x5f7   : > { %v1724_v40 = vpop.permute.xlu1 %1723  ;;  %v1720_v60 = vpop.permute.xlu0 %1719 }
 0x5f8   : > { %2393 = vrsqrt.f32 %v1703_v14 }
 0x5fb   : > { %v1748_v59 = vpop.permute.xlu1 %1747 }
 0x5ff   : > { %v1744_v52 = vpop.permute.xlu1 %1743 }
 0x601   : > { %v2390_v22 = vpop.eup %2389 }
 0x602   : > { %v2392_v24 = vpop.eup %2391  ;;  %v1710_v11 = vmul.f32 %v2390_v22, %v1670_v5  ;;  %v1711_v49 = vmul.f32 %v2390_v22, %v1671_v8 }
 0x603   : > { %v1716_v16 = vmul.f32 %v2392_v24, %v3311_v51  ;;  %v1717_v32 = vmul.f32 %v2392_v24, %v3313_v1  ;;  %v3398_v24 = vld [vmem:[%s3466_s4] sm:$0xff] }
 0x604   : > { %v1734_v7 = vmul.f32 %v1720_v60, %v1710_v11  ;;  %v1735_v30 = vmul.f32 %v1720_v60, %v1711_v49  ;;  %v3405_v49 = vld [vmem:[%s3466_s4 + $0x10] sm:$0xff] }
 0x605   : > { %v2394_v36 = vpop.eup %2393  ;;  %v1740_v54 = vmul.f32 %v1732_v23, %v1716_v16  ;;  %v1741_v51 = vmul.f32 %v1732_v23, %v1717_v32  ;;  %v2501_v23 = vmov 4  }
 0x606   : > { %v1712_v43 = vmul.f32 %v2394_v36, %v1672_v9  ;;  %v1713_v58 = vmul.f32 %v2394_v36, %v1673_v42  ;;  %v3352_v10 = vadd.f32 %v1744_v52, %v1734_v7  ;;  %v3354_v0 = vadd.f32 %v1744_v52, %v1735_v30 }
 0x607   : > { %v3358_v4 = vadd.f32 %v1756_v41, %v1740_v54  ;;  %v3360_v5 = vadd.f32 %v1756_v41, %v1741_v51  ;;  %v2498_v9 = vmov 9   ;;  %v2499_v42 = vmov 6  }
 0x608   : > { %v1736_v57 = vmul.f32 %v1724_v40, %v1712_v43  ;;  %v1737_v53 = vmul.f32 %v1724_v40, %v1713_v58  ;;  %v1766_v1 = vadd.f32 %v3354_v0, %v3352_v10 }
 0x609   : > { %v1813_v8 = vadd.f32 %v3360_v5, %v3358_v4 }
 0x60a   : > { %v3346_v38 = vadd.f32 %v1748_v59, %v1736_v57  ;;  %v3348_v61 = vadd.f32 %v1748_v59, %v1737_v53 }
 0x60c   : > { %v1769_v29 = vadd.f32 %v3348_v61, %v3346_v38 }
 0x60e   : > { %1770 = vadd.xlane.f32.xlu1 %v1769_v29 }
 0x612   : > { %1767 = vadd.xlane.f32.xlu1 %v1766_v1 }
 0x616   : > { %1814 = vadd.xlane.f32.xlu1 %v1813_v8 }
 0x627   : > { %1776 = vrot.lane.b32.xlu1 %v3331_v18, %s2486_s25 }
 0x62b   : > { %1843 = vperm.xlu1 %2371, %v3331_v18  }
 0x62f   : > { %2372 = vset.pattern.permute.xlu1 %v2498_v9 }
 0x630   : > { %1859 = vperm.xlu1 %2372, %v3325_v56  }
 0x634   : > { %1855 = vperm.xlu1 %2372, %v3331_v18  }
 0x638   : > { %2373 = vset.pattern.permute.xlu1 %v2499_v42 }
 0x639   : > { %1871 = vperm.xlu1 %2373, %v3325_v56  }
 0x63d   : > { %1867 = vperm.xlu1 %2373, %v3331_v18  }
 0x641   : > { %2374 = vset.pattern.permute.xlu1 %v2500_v2 }
 0x642   : > { %1883 = vperm.xlu1 %2374, %v3325_v56  }
 0x65e   : > { %v1812_v47 = vpop.xlane.xlu0 %1811 }
 0x65f   : > { %v1816_v28 = vmul.f32 0.00390625, %v1812_v47 }
 0x661   : > { %v3373_v46 = vsub.f32 %v3336_v35, %v1816_v28  ;;  %v3376_v62 = vsub.f32 %v3338_v50, %v1816_v28 }
 0x662   : > { %v1779_v26 = vpop.permute.xlu0 %1778 }
 0x663   : > { %v1822_v27 = vmul.f32 %v3373_v46, %v3373_v46  ;;  %v1823_v19 = vmul.f32 %v3376_v62, %v3376_v62 }
 0x665   : > { %v1826_v33 = vadd.f32 %v1823_v19, %v1822_v27 }
 0x667   : > { %1827 = vadd.xlane.f32.xlu0 %v1826_v33 }
 0x67d   : > { %1847 = vperm.xlu0 %2370, %v3325_v56  }
 0x681   : > { %1928 = vrot.lane.b32.xlu0 %v3386_v45, %s2488_s27 }
 0x682   : > { %2376 = vset.pattern.permute.xlu0 %v2501_v23 }
 0x697   : > { %v1771_v41 = vpop.xlane.xlu1 %1770 }
 0x698   : > { %v1773_v15 = vmul.f32 0.00390625, %v1771_v41 }
 0x69a   : > { %v1775_v25 = vmul.f32 %v3325_v56, %v1773_v15 }
 0x69b   : > { %v1768_v20 = vpop.xlane.xlu1 %1767 }
 0x69c   : > { %v1783_v55 = vadd.f32 %v1779_v26, %v1775_v25  ;;  %v1772_v48 = vmul.f32 0.00390625, %v1768_v20 }
 0x69e   : > { %v2235_v12 = vmul.f32 -1.442695, %v1783_v55  ;;  %v1774_v3 = vmul.f32 %v3331_v18, %v1772_v48 }
 0x69f   : > { %v1815_v17 = vpop.xlane.xlu1 %1814 }
 0x6a0   : > { %2395 = vpow2.f32 %v2235_v12  ;;  %v1817_v34 = vmul.f32 0.00390625, %v1815_v17 }
 0x6a2   : > { %v1820_v6 = vsub.f32 %v3358_v4, %v1817_v34  ;;  %v1821_v39 = vsub.f32 %v3360_v5, %v1817_v34 }
 0x6a3   : > { %v1777_v37 = vpop.permute.xlu1 %1776 }
 0x6a4   : > { %v1824_v31 = vmul.f32 %v1820_v6, %v1820_v6  ;;  %v1825_v21 = vmul.f32 %v1821_v39, %v1821_v39  ;;  %v1782_v44 = vadd.f32 %v1777_v37, %v1774_v3 }
 0x6a6   : > { %v2234_v13 = vmul.f32 -1.442695, %v1782_v44  ;;  %v1829_v14 = vadd.f32 %v1825_v21, %v1824_v31 }
 0x6a7   : > { %v1844_v43 = vpop.permute.xlu1 %1843 }
 0x6a8   : > { %2397 = vpow2.f32 %v2234_v13  ;;  %1830 = vadd.xlane.f32.xlu1 %v1829_v14 }
 0x6ab   : > { %v1860_v58 = vpop.permute.xlu1 %1859 }
 0x6ad   : > { %v2396_v56 = vpop.eup %2395 }
 0x6ae   : > { %v1791_v40 = vadd.f32 1.0, %v2396_v56 }
 0x6af   : > { %v1856_v16 = vpop.permute.xlu1 %1855 }
 0x6b0   : > { %2399 = vrcp.f32 %v1791_v40 }
 0x6b4   : > { %v1872_v30 = vpop.permute.xlu1 %1871 }
 0x6b5   : > { %v2398_v22 = vpop.eup %2397 }
 0x6b6   : > { %v1790_v59 = vadd.f32 1.0, %v2398_v22 }
 0x6b8   : > { %2401 = vrcp.f32 %v1790_v59  ;;  %v1868_v57 = vpop.permute.xlu1 %1867 }
 0x6b9   : > { %1879 = vperm.xlu1 %2374, %v3331_v18   ;;  %v3412_v18 = vld [vmem:[%s3466_s4 + $0x18] sm:$0xff] }
 0x6bd   : > { %1926 = vrot.lane.b32.xlu1 %v3398_v24, %s2488_s27  ;;  %v2400_v11 = vpop.eup %2399  ;;  %v1884_v53 = vpop.permute.xlu1 %1883 }
 0x6be   : > { %2375 = vset.pattern.permute.xlu1 %v2501_v23 }
 0x6c1   : > { %1803 = vperm.xlu1 %2375, %v2400_v11  }
 0x6c5   : > { %v2402_v36 = vpop.eup %2401  ;;  %1930 = vrot.lane.b32.xlu1 %v3405_v49, %s2488_s27 }
 0x6c6   : > { %1798 = vperm.xlu0 %2376, %v2402_v36  }
 0x6c9   : > { %1932 = vrot.lane.b32.xlu1 %v3412_v18, %s2488_s27  ;;  %s2251_s27 = sshll.u32 %s3485_s19, 6 }
 0x6ca   : > { %2377 = vset.pattern.permute.xlu0 %v2500_v2  ;;  %s3449_s7 = scalar_lea.vmem %s3467_s5, %s2251_s27 }
 0x6f0   : > { %v1828_v60 = vpop.xlane.xlu0 %1827 }
 0x6f1   : > { %v1832_v32 = vmul.f32 0.00390625, %v1828_v60 }
 0x6f3   : > { %v1834_v7 = vadd.f32 1e-05, %v1832_v32 }
 0x6f5   : > { %2403 = vrsqrt.f32 %v1834_v7 }
 0x6f8   : > { %v1848_v26 = vpop.permute.xlu0 %1847 }
 0x6fc   : > { %v1929_v36 = vpop.permute.xlu0 %1928 }
 0x702   : > { %v2404_v54 = vpop.eup %2403 }
 0x703   : > { %v1839_v1 = vmul.f32 %v2404_v54, %v3376_v62  ;;  %v1838_v8 = vmul.f32 %v2404_v54, %v3373_v46 }
 0x705   : > { %v1851_v9 = vmul.f32 %v1844_v43, %v1839_v1  ;;  %v1850_v42 = vmul.f32 %v1844_v43, %v1838_v8 }
 0x707   : > { %v1863_v2 = vadd.f32 %v1856_v16, %v1851_v9  ;;  %v1862_v47 = vadd.f32 %v1856_v16, %v1850_v42 }
 0x709   : > { %v1875_v27 = vmul.f32 %v1868_v57, %v1863_v2  ;;  %v1874_v23 = vmul.f32 %v1868_v57, %v1862_v47 }
 0x731   : > { %v1831_v52 = vpop.xlane.xlu1 %1830 }
 0x732   : > { %v1833_v29 = vmul.f32 0.00390625, %v1831_v52 }
 0x734   : > { %v1835_v51 = vadd.f32 1e-05, %v1833_v29 }
 0x735   : > { %v1880_v28 = vpop.permute.xlu1 %1879 }
 0x736   : > { %2405 = vrsqrt.f32 %v1835_v51  ;;  %v1887_v33 = vadd.f32 %v1880_v28, %v1875_v27  ;;  %v1886_v25 = vadd.f32 %v1880_v28, %v1874_v23 }
 0x738   : > { %v2237_v48 = vmul.f32 -1.442695, %v1887_v33  ;;  %v2236_v17 = vmul.f32 -1.442695, %v1886_v25 }
 0x739   : > { %v1927_v59 = vpop.permute.xlu1 %1926 }
 0x73a   : > { %2407 = vpow2.f32 %v2237_v48 }
 0x73b   : > { %2409 = vpow2.f32 %v2236_v17 }
 0x73d   : > { %v1804_v7 = vpop.permute.xlu1 %1803 }
 0x73e   : > { %v1809_v52 = vmul.f32 %v1804_v7, %v3348_v61  ;;  %v1808_v54 = vmul.f32 %v1804_v7, %v3346_v38 }
 0x741   : > { %v1799_v57 = vpop.permute.xlu0 %1798 }
 0x742   : > { %v1807_v29 = vmul.f32 %v1799_v57, %v3354_v0 }
 0x743   : > { %v2406_v19 = vpop.eup %2405 }
 0x744   : > { %v1840_v41 = vmul.f32 %v2406_v19, %v1820_v6  ;;  %v1841_v15 = vmul.f32 %v2406_v19, %v1821_v39 }
 0x746   : > { %v1852_v20 = vmul.f32 %v1848_v26, %v1840_v41  ;;  %v1853_v55 = vmul.f32 %v1848_v26, %v1841_v15 }
 0x747   : > { %v2408_v6 = vpop.eup %2407 }
 0x748   : > { %v1864_v62 = vadd.f32 %v1860_v58, %v1852_v20  ;;  %v1865_v12 = vadd.f32 %v1860_v58, %v1853_v55  ;;  %v2410_v39 = vpop.eup %2409  ;;  %v1903_v44 = vadd.f32 1.0, %v2408_v6 }
 0x749   : > { %v1902_v56 = vadd.f32 1.0, %v2410_v39 }
 0x74a   : > { %v1876_v46 = vmul.f32 %v1872_v30, %v1864_v62  ;;  %v1877_v34 = vmul.f32 %v1872_v30, %v1865_v12 }
 0x74c   : > { %v1888_v3 = vadd.f32 %v1884_v53, %v1876_v46  ;;  %v1889_v37 = vadd.f32 %v1884_v53, %v1877_v34 }
 0x74e   : > { %v2238_v31 = vmul.f32 -1.442695, %v1888_v3  ;;  %v2239_v21 = vmul.f32 -1.442695, %v1889_v37 }
 0x750   : > { %2411 = vpow2.f32 %v2238_v31 }
 0x751   : > { %2413 = vpow2.f32 %v2239_v21 }
 0x752   : > { %2415 = vrcp.f32 %v1903_v44 }
 0x75d   : > { %v2412_v13 = vpop.eup %2411 }
 0x75e   : > { %v2414_v14 = vpop.eup %2413  ;;  %v1904_v40 = vadd.f32 1.0, %v2412_v13 }
 0x75f   : > { %v1905_v22 = vadd.f32 1.0, %v2414_v14  ;;  %v2416_v11 = vpop.eup %2415 }
 0x760   : > { %2417 = vrcp.f32 %v1904_v40  ;;  %v1915_v30 = vmul.f32 %v2416_v11, %v3338_v50  ;;  %v1931_v50 = vpop.permute.xlu1 %1930 }
 0x761   : > { %2419 = vrcp.f32 %v1905_v22 }
 0x762   : > { %2421 = vrcp.f32 %v1902_v56 }
 0x76d   : > { %v2418_v43 = vpop.eup %2417 }
 0x76e   : > { %v2420_v58 = vpop.eup %2419  ;;  %v1916_v60 = vmul.f32 %v2418_v43, %v3358_v4  ;;  %v1806_v4 = vmul.f32 %v1799_v57, %v3352_v10 }
 0x76f   : > { %v2422_v16 = vpop.eup %2421  ;;  %v1917_v32 = vmul.f32 %v2420_v58, %v3360_v5 }
 0x770   : > { %v1914_v53 = vmul.f32 %v2422_v16, %v3336_v35  ;;  %v1933_v35 = vpop.permute.xlu1 %1932 }
 0x771   : > { %1970 = vmatprep.subr.mxu0 %v1917_v32 }
 0x772   : > { %1971 = vmatpush1.msra.mxu0 %v1916_v60 }
 0x773   : > { %1972 = vmatprep.subr.mxu0 %v1915_v30 }
 0x774   : > { %1973 = vmatpush1.msra.mxu0 %v1914_v53 }
 0x775   : > { %2240 = vmatmul.mubr.msk.f32.vlgmr.msra.gmra.mxu0 %vm314_vm12, %v1927_v59  ;;  %2067 = vmatprep.subr.mxu0 %v1809_v52 }
 0x776   : > { %2068 = vmatpush1.msra.mxu0 %v1808_v54  ;;  %2012 = vmatprep.mubr.f32.mxu0 %v3278_v63 }
 0x777   : > { %2069 = vmatprep.subr.mxu0 %v1807_v29 }
 0x778   : > { %2070 = vmatpush1.msra.mxu0 %v1806_v4 }
 0x779   : > { %2241 = vmatmul.mubr.msk.f32.gmra.mxu0 %vm314_vm12, %v1929_v36 }
 0x77a   : > { %2018 = vmatprep.mubr.f32.mxu0 %v3278_v63 }
 0x77d   : > { %2242 = vmatmul.mubr.msk.f32.gmra.mxu0 %vm314_vm12, %v1931_v50 }
 0x77e   : > { %2024 = vmatprep.mubr.f32.mxu0 %v3278_v63 }
 0x781   : > { %2243 = vmatmul.mubr.msk.f32.gmra.mxu0 %vm314_vm12, %v1933_v35 }
 0x782   : > { %2103 = vmatprep.mubr.f32.mxu0 %v3278_v63 }
 0x785   : > { %2244 = vmatmul.mubr.msk.f32.vlgmr.msra.gmra.mxu0 %vm314_vm12, %v3398_v24 }
 0x786   : > { %2109 = vmatprep.mubr.f32.mxu0 %v3278_v63 }
 0x789   : > { %2245 = vmatmul.mubr.msk.f32.gmra.mxu0 %vm314_vm12, %v3386_v45 }
 0x78a   : > { %2115 = vmatprep.mubr.f32.mxu0 %v3278_v63 }
 0x78d   : > { %2246 = vmatmul.mubr.msk.f32.gmra.mxu0 %vm314_vm12, %v3405_v49 }
 0x78e   : > { %2121 = vmatprep.mubr.f32.mxu0 %v3278_v63 }
 0x791   : > { %2247 = vmatmul.mubr.msk.f32.gmra.mxu0 %vm314_vm12, %v3412_v18 }
 0x835   : > { %v2008_v38 = vpop.f32.mrf.mxu0 }
 0x837   : > { %v2010_v61 = vpop.f32.mrf.mxu0 }
 0x839   : > { %v2014_v10 = vpop.f32.mrf.mxu0 }
 0x83b   : > { %v2016_v0 = vpop.f32.mrf.mxu0 }
 0x83d   : > { %v2020_v5 = vpop.f32.mrf.mxu0 }
 0x83f   : > { %v2022_v24 = vpop.f32.mrf.mxu0 }
 0x841   : > { %v2026_v51 = vpop.f32.mrf.mxu0 }
 0x843   : > { %v2028_v1 = vpop.f32.mrf.mxu0 }
 0x845   : > { %v2105_v45 = vpop.f32.mrf.mxu0 }
 0x846   : > { %v2106_v8 = vadd.f32 %v2105_v45, %v2008_v38 }
 0x847   : > { %v2107_v9 = vpop.f32.mrf.mxu0 }
 0x848   : > { %vm2128_vm1 = vcmp.ge.f32.partialorder %v2106_v8, 0.0  ;;  %v2136_v63 = vmul.f32 0.01, %v2106_v8  ;;  %v2108_v49 = vadd.f32 %v2107_v9, %v2010_v61 }
 0x849   : > { %v2111_v18 = vpop.f32.mrf.mxu0 }
 0x84a   : > { %v2144_v42 = vsel %vm2128_vm1, %v2106_v8, %v2136_v63  ;;  %vm2129_vm2 = vcmp.ge.f32.partialorder %v2108_v49, 0.0  ;;  %v2137_v2 = vmul.f32 0.01, %v2108_v49  ;;  %v2112_v47 = vadd.f32 %v2111_v18, %v2014_v10 }
 0x84b   : > { %2152 = vst [vmem:[%s3449_s7] sm:$0xff] %v2144_v42  ;;  %v2113_v28 = vpop.f32.mrf.mxu0 }
 0x84c   : > { %v2145_v27 = vsel %vm2129_vm2, %v2108_v49, %v2137_v2  ;;  %vm2130_vm3 = vcmp.ge.f32.partialorder %v2112_v47, 0.0  ;;  %v2138_v19 = vmul.f32 0.01, %v2112_v47  ;;  %v2114_v33 = vadd.f32 %v2113_v28, %v2016_v0 }
 0x84d   : > { %2153 = vst [vmem:[%s3449_s7 + $0x8] sm:$0xff] %v2145_v27  ;;  %v2117_v23 = vpop.f32.mrf.mxu0 }
 0x84e   : > { %v2146_v41 = vsel %vm2130_vm3, %v2112_v47, %v2138_v19  ;;  %vm2131_vm4 = vcmp.ge.f32.partialorder %v2114_v33, 0.0  ;;  %v2139_v15 = vmul.f32 0.01, %v2114_v33  ;;  %v2118_v26 = vadd.f32 %v2117_v23, %v2020_v5 }
 0x84f   : > { %2154 = vst [vmem:[%s3449_s7 + $0x10] sm:$0xff] %v2146_v41  ;;  %v2119_v25 = vpop.f32.mrf.mxu0 }
 0x850   : > { %v2147_v20 = vsel %vm2131_vm4, %v2114_v33, %v2139_v15  ;;  %vm2132_vm5 = vcmp.ge.f32.partialorder %v2118_v26, 0.0  ;;  %v2140_v55 = vmul.f32 0.01, %v2118_v26  ;;  %v2120_v48 = vadd.f32 %v2119_v25, %v2022_v24 }
 0x851   : > { %2155 = vst [vmem:[%s3449_s7 + $0x18] sm:$0xff] %v2147_v20  ;;  %v2123_v62 = vpop.f32.mrf.mxu0 }
 0x852   : > { %v2148_v12 = vsel %vm2132_vm5, %v2118_v26, %v2140_v55  ;;  %vm2133_vm6 = vcmp.ge.f32.partialorder %v2120_v48, 0.0  ;;  %v2141_v17 = vmul.f32 0.01, %v2120_v48  ;;  %v2124_v46 = vadd.f32 %v2123_v62, %v2026_v51 }
 0x853   : > { %2156 = vst [vmem:[%s3449_s7 + $0x20] sm:$0xff] %v2148_v12  ;;  %v2125_v34 = vpop.f32.mrf.mxu0 }
 0x854   : > { %v2149_v3 = vsel %vm2133_vm6, %v2120_v48, %v2141_v17  ;;  %vm2134_vm7 = vcmp.ge.f32.partialorder %v2124_v46, 0.0  ;;  %v2142_v37 = vmul.f32 0.01, %v2124_v46  ;;  %v2126_v31 = vadd.f32 %v2125_v34, %v2028_v1 }
 0x855   : > { %2157 = vst [vmem:[%s3449_s7 + $0x28] sm:$0xff] %v2149_v3 }
 0x856   : > { %v2150_v21 = vsel %vm2134_vm7, %v2124_v46, %v2142_v37  ;;  %vm2135_vm9 = vcmp.ge.f32.partialorder %v2126_v31, 0.0  ;;  %v2143_v6 = vmul.f32 0.01, %v2126_v31 }
 0x857   : > { %2158 = vst [vmem:[%s3449_s7 + $0x30] sm:$0xff] %v2150_v21 }
 0x858   : > { %v2151_v39 = vsel %vm2135_vm9, %v2126_v31, %v2143_v6 }
 0x859   : > { %2159 = vst [vmem:[%s3449_s7 + $0x38] sm:$0xff] %v2151_v39 }
 0x85a PF: > { %s15_s18 = sadd.s32 1, %s2482_s18  }
 0x85b   : > { %p12_p4 = scmp.ge.s32.totalorder %s15_s18, 4  }
 0x85d   :  { %14 = sbr.rel (!%p12_p4) target bundleno = 1 (0x1), region = 70 }

</bundles_post_ra>
